<compile_context>
chip_gen: v7x
topology: tpu7x:2x2x1
jax: 0.10.0
libtpu: 0.0.40
codegen_flags: <defaults>
</compile_context>

<pallas_src>
import functools

import jax
import jax.numpy as jnp
from jax import lax
from jax.experimental import pallas as pl
from jax.experimental.pallas import tpu as pltpu


# ---------------------------------------------------------------------------
# Fused kernel.  Activations are (rc, H*W) f32: channels on sublanes, flat
# spatial on lanes.  Pool / deconv never change the array shape -- valid data
# simply lives on a stride-1 / 2 / 4 lattice of the same slab.
# ---------------------------------------------------------------------------

def _spatial_gate_kernel(x_ref, w1t_ref, s1_ref,
                         ma_ref, w9a_ref, sa_ref,
                         mb_ref, w9b_ref, sb_ref,
                         dm0_ref, wt0_ref, bt0_ref,
                         dm1_ref, wt1_ref, bt1_ref,
                         wf_ref, bf_ref,
                         o_ref, acc_ref, *, H, W, dil, rc):
    n = H * W
    ct = pl.program_id(1)

    # ---- 1x1 reduce conv: accumulate this channel tile (bf16 MXU, f32 acc) ----
    @pl.when(ct == 0)
    def _():
        acc_ref[...] = jnp.zeros_like(acc_ref)

    acc_ref[...] += lax.dot_general(
        w1t_ref[...], x_ref[0],
        dimension_numbers=(((0,), (0,)), ((), ())),
        preferred_element_type=jnp.float32)                     # (rc, n)

    # ---- rest of the gate runs once per batch, on the last channel tile ----
    @pl.when(ct == pl.num_programs(1) - 1)
    def _():
        y = jnp.maximum(acc_ref[...] + s1_ref[...], 0.0)        # (rc, n) f32

        def conv3x3_relu(y, w9_ref, shift_ref, mask_ref, stride):
            # 3x3 dilated conv on the stride-`stride` lattice: 9 rolled taps
            # masked by precomputed border masks, packed into one MXU matmul.
            m = mask_ref[...]                                   # (9, n) f32
            taps = []
            for ky in range(3):
                for kx in range(3):
                    k = ky * 3 + kx
                    off = stride * dil * ((ky - 1) * W + (kx - 1))
                    t = pltpu.roll(y, shift=(-off) % n, axis=1) if off % n else y
                    taps.append(t * m[k:k + 1, :])
            slab = jnp.concatenate(taps, axis=0).astype(jnp.bfloat16)   # (9rc, n)
            out = jnp.dot(w9_ref[...], slab, preferred_element_type=jnp.float32)
            return jnp.maximum(out + shift_ref[...], 0.0)

        def pool2x2(y, stride):
            # 2x2 stride-2 max pool on the stride-`stride` lattice: two rolls,
            # result valid on the stride-`2*stride` lattice (no compaction).
            m = jnp.maximum(y, pltpu.roll(y, shift=(-stride) % n, axis=1))
            return jnp.maximum(m, pltpu.roll(m, shift=(-stride * W) % n, axis=1))

        def deconv2x2_relu(y, wt_ref, b_ref, mask_ref, out_stride):
            # ConvTranspose2d(k=2, s=2): one packed channel matmul, then the
            # depth-to-space scatter is 4 rolls + 0/1 sub-lattice masks.
            t_all = jnp.dot(wt_ref[...], y.astype(jnp.bfloat16),
                            preferred_element_type=jnp.float32)  # (4rc, n)
            m = mask_ref[...]                                    # (4, n) f32
            out = jnp.zeros((rc, n), jnp.float32)
            for a in range(2):
                for b in range(2):
                    k = a * 2 + b
                    shift = out_stride * (a * W + b)
                    chunk = t_all[k * rc:(k + 1) * rc, :]
                    if shift % n:
                        chunk = pltpu.roll(chunk, shift=shift % n, axis=1)
                    out = out + chunk * m[k:k + 1, :]
            return jnp.maximum(out + b_ref[...], 0.0)

        y = conv3x3_relu(y, w9a_ref, sa_ref, ma_ref, 1)   # full-res lattice
        y = pool2x2(y, 1)                                 # -> stride-2 lattice
        y = conv3x3_relu(y, w9b_ref, sb_ref, mb_ref, 2)   # on stride-2 lattice
        y = pool2x2(y, 2)                                 # -> stride-4 lattice
        y = deconv2x2_relu(y, wt0_ref, bt0_ref, dm0_ref, 2)  # -> stride-2
        y = deconv2x2_relu(y, wt1_ref, bt1_ref, dm1_ref, 1)  # -> full res

        gate = (jnp.dot(wf_ref[...], y.astype(jnp.bfloat16),
                        preferred_element_type=jnp.float32)
                + bf_ref[...])                            # (1, n)
        o_ref[0] = gate


# ---------------------------------------------------------------------------
# Host-side parameter folding, mask precompute, and the single pallas_call
# ---------------------------------------------------------------------------

def _bn_fold(conv_w, conv_b, gamma, beta, mean, var, eps=1e-5):
    scale = gamma / jnp.sqrt(var + eps)
    shift = beta + scale * (conv_b - mean)
    w_folded = conv_w * scale.reshape((-1,) + (1,) * (conv_w.ndim - 1))
    return w_folded, shift


def _conv_tap_masks(h, w, dil, stride):
    """(9, h*w) border-validity masks for a dilated 3x3 conv on the stride lattice."""
    p = jnp.arange(h * w, dtype=jnp.int32)
    py, px = p // w, p % w
    ly, lx = py // stride, px // stride
    lh, lw = h // stride, w // stride
    ms = []
    for ky in range(3):
        for kx in range(3):
            dy, dx = dil * (ky - 1), dil * (kx - 1)
            ok = (ly + dy >= 0) & (ly + dy < lh) & (lx + dx >= 0) & (lx + dx < lw)
            ms.append(ok)
    return jnp.stack(ms).astype(jnp.float32)


def _deconv_lattice_masks(h, w, out_stride):
    """(4, h*w) sub-lattice selection masks for the stride-2 deconv scatter."""
    p = jnp.arange(h * w, dtype=jnp.int32)
    py, px = p // w, p % w
    ms = []
    for a in range(2):
        for b in range(2):
            ok = ((py % (2 * out_stride)) == a * out_stride) & \
                 ((px % (2 * out_stride)) == b * out_stride)
            ms.append(ok)
    return jnp.stack(ms).astype(jnp.float32)


def spatial_gate_forward(x_nchw, p, *, dilation=4, c_tile=None):
    """Forward of SpatialGate.  Input/Output are NCHW like PyTorch."""
    n, c, h, w = x_nchw.shape
    rc = p['w_reduce'].shape[0]
    assert h % 4 == 0 and w % 4 == 0, "spatial dims must be divisible by 4"
    hw = h * w
    rcp = max(8, ((rc + 7) // 8) * 8)        # pad channels for sublane alignment

    # Fold BatchNorm (inference mode) scale into the conv weights.
    w1, s1 = _bn_fold(p['w_reduce'].reshape(rc, c), p['b_reduce'],
                      p['bn0_g'], p['bn0_b'], p['bn0_m'], p['bn0_v'])
    wd0, sd0 = _bn_fold(p['w_di0'], p['b_di0'],
                        p['bn1_g'], p['bn1_b'], p['bn1_m'], p['bn1_v'])
    wd1, sd1 = _bn_fold(p['w_di1'], p['b_di1'],
                        p['bn2_g'], p['bn2_b'], p['bn2_m'], p['bn2_v'])

    # 1x1 reduce weight stored transposed (C, rcp) so the C-tile axis is the
    # sublane (blockable) dim.
    w1t = jnp.pad(w1.T, ((0, 0), (0, rcp - rc)))

    def conv9(wd):        # (rc,rc,3,3) -> (rcp, 9*rcp), columns (tap, in_ch)
        wdp = jnp.pad(wd, ((0, rcp - rc), (0, rcp - rc), (0, 0), (0, 0)))
        return jnp.transpose(wdp, (0, 2, 3, 1)).reshape(rcp, 9 * rcp)

    def deconv4(wt):      # torch (in,out,2,2) -> (4*rcp, rcp), rows (tap, out_ch)
        wtp = jnp.pad(wt, ((0, rcp - rc), (0, rcp - rc), (0, 0), (0, 0)))
        return jnp.transpose(wtp, (2, 3, 1, 0)).reshape(4 * rcp, rcp)

    colp = lambda v: jnp.pad(jnp.asarray(v, jnp.float32).reshape(-1, 1),
                             ((0, rcp - rc), (0, 0)))
    bf16 = lambda v: jnp.asarray(v, jnp.bfloat16)

    w9a, w9b = conv9(wd0), conv9(wd1)
    wt0p, wt1p = deconv4(p['w_dc0']), deconv4(p['w_dc1'])
    wf = jnp.pad(p['w_final'].reshape(1, rc), ((0, 0), (0, rcp - rc)))
    bfin = jnp.asarray(p['b_final'], jnp.float32).reshape(1, 1)

    # Precomputed masks -- no iota/compare/select work inside the kernel.
    ma = _conv_tap_masks(h, w, dilation, 1)
    mb = _conv_tap_masks(h, w, dilation, 2)
    dm0 = _deconv_lattice_masks(h, w, 2)
    dm1 = _deconv_lattice_masks(h, w, 1)

    weights = (bf16(w1t), colp(s1),
               ma, bf16(w9a), colp(sd0),
               mb, bf16(w9b), colp(sd1),
               dm0, bf16(wt0p), colp(p['b_dc0']),
               dm1, bf16(wt1p), colp(p['b_dc1']),
               bf16(wf), bfin)

    # Channel tile for the 1x1 reduce accumulation (keeps the x block small).
    if c_tile is None:
        c_tile = c
        for cand in (256, 128, 64, 32, 16):
            if c % cand == 0:
                c_tile = cand
                break
    assert c % c_tile == 0 and (c_tile % 16 == 0 or c_tile == c)
    num_ct = c // c_tile

    # Free reshape of the NCHW input; bf16 halves the dominant HBM read.
    x_flat = x_nchw.reshape(n, c, hw).astype(jnp.bfloat16)

    def const_spec(arr):
        nd = arr.ndim
        return pl.BlockSpec(arr.shape, lambda b, ct, _nd=nd: (0,) * _nd)

    in_specs = [pl.BlockSpec((1, c_tile, hw), lambda b, ct: (b, ct, 0)),
                pl.BlockSpec((c_tile, rcp), lambda b, ct: (ct, 0))]
    in_specs += [const_spec(a) for a in weights[1:]]

    # Explicit VMEM budget sized from the actual blocks (+ intermediates slack).
    wbytes = sum(int(a.size) * a.dtype.itemsize for a in weights)
    vmem_bytes = (2 * c_tile * hw * 2            # double-buffered bf16 x block
                  + 2 * hw * 4                   # gate output block
                  + 2 * wbytes                   # weights + masks
                  + rcp * hw * 4                 # reduce accumulator scratch
                  + 24 * rcp * hw * 4            # in-kernel intermediates
                  + (2 << 20))
    vmem_bytes = int(min(max(vmem_bytes, 8 << 20), 64 << 20))

    gate = pl.pallas_call(
        functools.partial(_spatial_gate_kernel, H=h, W=w, dil=dilation, rc=rcp),
        out_shape=jax.ShapeDtypeStruct((n, 1, hw), jnp.float32),
        grid=(n, num_ct),
        in_specs=in_specs,
        out_specs=pl.BlockSpec((1, 1, hw), lambda b, ct: (b, 0, 0)),
        scratch_shapes=[pltpu.VMEM((rcp, hw), jnp.float32)],
        compiler_params=pltpu.CompilerParams(
            dimension_semantics=("parallel", "arbitrary"),
            vmem_limit_bytes=vmem_bytes),
    )(x_flat, *weights)

    # .expand_as: the kernel emits only the 1-channel gate; the broadcast is
    # left to the consumer (here, the wrapper) so the C-times-larger write is
    # not paid inside the kernel and can fuse with downstream use.
    return jnp.broadcast_to(gate.reshape(n, 1, h, w), (n, c, h, w))


# ---------------------------------------------------------------------------
# Deterministic parameter init (synthetic; same shapes as the torch module)
# ---------------------------------------------------------------------------

def init_params(key, gate_channel, reduction_ratio=16):
    rc = gate_channel // reduction_ratio
    keys = jax.random.split(key, 12)

    def nrm(k, shape, s=0.1):
        return jax.random.normal(k, shape, jnp.float32) * s

    p = {
        'w_reduce': nrm(keys[0], (rc, gate_channel, 1, 1)),
        'b_reduce': nrm(keys[1], (rc,), 0.05),
        'w_di0': nrm(keys[2], (rc, rc, 3, 3)),
        'b_di0': nrm(keys[3], (rc,), 0.05),
        'w_di1': nrm(keys[4], (rc, rc, 3, 3)),
        'b_di1': nrm(keys[5], (rc,), 0.05),
        'w_dc0': nrm(keys[6], (rc, rc, 2, 2)),
        'b_dc0': nrm(keys[7], (rc,), 0.05),
        'w_dc1': nrm(keys[8], (rc, rc, 2, 2)),
        'b_dc1': nrm(keys[9], (rc,), 0.05),
        'w_final': nrm(keys[10], (1, rc, 1, 1)),
        'b_final': nrm(keys[11], (1,), 0.05),
    }
    for i in range(3):  # BatchNorm (inference-mode) params
        p[f'bn{i}_g'] = jnp.ones((rc,), jnp.float32)
        p[f'bn{i}_b'] = jnp.zeros((rc,), jnp.float32)
        p[f'bn{i}_m'] = jnp.zeros((rc,), jnp.float32)
        p[f'bn{i}_v'] = jnp.ones((rc,), jnp.float32)
    return p


# ---------------------------------------------------------------------------
# Pure-JAX reference (for correctness check only)
# ---------------------------------------------------------------------------

def reference_forward(x_nchw, p):
    def conv(x, w, b, dilation=1, padding=0):
        y = lax.conv_general_dilated(
            x, jnp.transpose(w, (2, 3, 1, 0)),
            window_strides=(1, 1),
            padding=((padding, padding), (padding, padding)),
            rhs_dilation=(dilation, dilation),
            dimension_numbers=('NHWC', 'HWIO', 'NHWC'))
        return y + b

    def bn(x, g, be, m, v, eps=1e-5):
        return (x - m) / jnp.sqrt(v + eps) * g + be

    def pool(x):
        n, h, w, c = x.shape
        return jnp.max(x.reshape(n, h // 2, 2, w // 2, 2, c), axis=(2, 4))

    def deconv(x, w, b):
        y = jnp.einsum('nijc,cdab->niajbd', x, w)
        n, h, _, w_, _, d = y.shape
        return y.reshape(n, 2 * h, 2 * w_, d) + b

    x = jnp.transpose(x_nchw, (0, 2, 3, 1))
    y = jax.nn.relu(bn(conv(x, p['w_reduce'], p['b_reduce']),
                       p['bn0_g'], p['bn0_b'], p['bn0_m'], p['bn0_v']))
    y = jax.nn.relu(bn(conv(y, p['w_di0'], p['b_di0'], 4, 4),
                       p['bn1_g'], p['bn1_b'], p['bn1_m'], p['bn1_v']))
    y = pool(y)
    y = jax.nn.relu(bn(conv(y, p['w_di1'], p['b_di1'], 4, 4),
                       p['bn2_g'], p['bn2_b'], p['bn2_m'], p['bn2_v']))
    y = pool(y)
    y = jax.nn.relu(deconv(y, p['w_dc0'], p['b_dc0']))
    y = jax.nn.relu(deconv(y, p['w_dc1'], p['b_dc1']))
    gate = conv(y, p['w_final'], p['b_final'])
    n, h, w, _ = gate.shape
    c = x_nchw.shape[1]
    return jnp.broadcast_to(jnp.transpose(gate, (0, 3, 1, 2)), (n, c, h, w))


if __name__ == "__main__":
    key = jax.random.PRNGKey(0)
    k_x, k_p = jax.random.split(key)
    N, C, H, W = 2, 32, 16, 16          # gate_channel=32 -> reducted_channels=2
    x = jax.random.normal(k_x, (N, C, H, W), jnp.float32)
    params = init_params(k_p, C)

    fwd = jax.jit(functools.partial(spatial_gate_forward, dilation=4, c_tile=16))
    out = jax.block_until_ready(fwd(x, params))

    assert out.shape == (N, C, H, W)
    ref = reference_forward(x, params)
    err = float(jnp.max(jnp.abs(out - ref)))
    scale = float(jnp.max(jnp.abs(ref)))
    # bf16 MXU operands with f32 accumulation: use a relative tolerance.
    assert err <= max(0.05 * scale, 1e-2), f"max abs err {err} (ref scale {scale})"
    print("KERNEL_OK")
</pallas_src>

<mosaic_0001>
module attributes {stable_mosaic.version = 11 : i64} {
  func.func @_spatial_gate_kernel(%arg0: i32, %arg1: i32, %arg2: memref<1x16x256xbf16, #tpu.memory_space<vmem>>, %arg3: memref<16x8xbf16, #tpu.memory_space<vmem>>, %arg4: memref<8x1xf32, #tpu.memory_space<vmem>>, %arg5: memref<9x256xf32, #tpu.memory_space<vmem>>, %arg6: memref<8x72xbf16, #tpu.memory_space<vmem>>, %arg7: memref<8x1xf32, #tpu.memory_space<vmem>>, %arg8: memref<9x256xf32, #tpu.memory_space<vmem>>, %arg9: memref<8x72xbf16, #tpu.memory_space<vmem>>, %arg10: memref<8x1xf32, #tpu.memory_space<vmem>>, %arg11: memref<4x256xf32, #tpu.memory_space<vmem>>, %arg12: memref<32x8xbf16, #tpu.memory_space<vmem>>, %arg13: memref<8x1xf32, #tpu.memory_space<vmem>>, %arg14: memref<4x256xf32, #tpu.memory_space<vmem>>, %arg15: memref<32x8xbf16, #tpu.memory_space<vmem>>, %arg16: memref<8x1xf32, #tpu.memory_space<vmem>>, %arg17: memref<1x8xbf16, #tpu.memory_space<vmem>>, %arg18: memref<1x1xf32, #tpu.memory_space<vmem>>, %arg19: memref<1x1x256xf32, #tpu.memory_space<vmem>>, %arg20: memref<8x256xf32, #tpu.memory_space<vmem>>) attributes {dimension_semantics = [#tpu.dimension_semantics<parallel>, #tpu.dimension_semantics<arbitrary>], iteration_bounds = array<i64: 2, 2>, scalar_prefetch = 0 : i64, scratch_operands = 1 : i64, tpu.core_type = #tpu.core_type<tc>, window_params = [{transform_indices = @transform_0, window_bounds = array<i64: 1, 16, 256>}, {transform_indices = @transform_1, window_bounds = array<i64: 16, 8>}, {pipeline_mode = #tpu.pipeline_mode<synchronous>, transform_indices = @transform_2, window_bounds = array<i64: 8, 1>}, {pipeline_mode = #tpu.pipeline_mode<synchronous>, transform_indices = @transform_3, window_bounds = array<i64: 9, 256>}, {pipeline_mode = #tpu.pipeline_mode<synchronous>, transform_indices = @transform_4, window_bounds = array<i64: 8, 72>}, {pipeline_mode = #tpu.pipeline_mode<synchronous>, transform_indices = @transform_5, window_bounds = array<i64: 8, 1>}, {pipeline_mode = #tpu.pipeline_mode<synchronous>, transform_indices = @transform_6, window_bounds = array<i64: 9, 256>}, {pipeline_mode = #tpu.pipeline_mode<synchronous>, transform_indices = @transform_7, window_bounds = array<i64: 8, 72>}, {pipeline_mode = #tpu.pipeline_mode<synchronous>, transform_indices = @transform_8, window_bounds = array<i64: 8, 1>}, {pipeline_mode = #tpu.pipeline_mode<synchronous>, transform_indices = @transform_9, window_bounds = array<i64: 4, 256>}, {pipeline_mode = #tpu.pipeline_mode<synchronous>, transform_indices = @transform_10, window_bounds = array<i64: 32, 8>}, {pipeline_mode = #tpu.pipeline_mode<synchronous>, transform_indices = @transform_11, window_bounds = array<i64: 8, 1>}, {pipeline_mode = #tpu.pipeline_mode<synchronous>, transform_indices = @transform_12, window_bounds = array<i64: 4, 256>}, {pipeline_mode = #tpu.pipeline_mode<synchronous>, transform_indices = @transform_13, window_bounds = array<i64: 32, 8>}, {pipeline_mode = #tpu.pipeline_mode<synchronous>, transform_indices = @transform_14, window_bounds = array<i64: 8, 1>}, {pipeline_mode = #tpu.pipeline_mode<synchronous>, transform_indices = @transform_15, window_bounds = array<i64: 1, 8>}, {pipeline_mode = #tpu.pipeline_mode<synchronous>, transform_indices = @transform_16, window_bounds = array<i64: 1, 1>}, {transform_indices = @transform_17, window_bounds = array<i64: 1, 1, 256>}]} {
    %c0_i32 = arith.constant 0 : i32
    %0 = arith.cmpi eq, %arg1, %c0_i32 : i32
    %1 = arith.extui %0 : i1 to i32
    %c0_i32_0 = arith.constant 0 : i32
    %2 = arith.cmpi ne, %1, %c0_i32_0 : i32
    scf.if %2 {
      %cst_10 = arith.constant 0.000000e+00 : f32
      %13 = vector.broadcast %cst_10 : f32 to vector<8x256xf32>
      %c0_11 = arith.constant 0 : index
      %c0_12 = arith.constant 0 : index
      %14 = vector.load %arg20[%c0_11, %c0_12] : memref<8x256xf32, #tpu.memory_space<vmem>>, vector<8x256xf32>
      tpu.vector_store %arg20[%c0_11, %c0_12], %13 {strides = array<i32>} : memref<8x256xf32, #tpu.memory_space<vmem>>, vector<8x256xf32>,
    } else {
    }
    %c0 = arith.constant 0 : index
    %c0_1 = arith.constant 0 : index
    %3 = vector.load %arg20[%c0, %c0_1] : memref<8x256xf32, #tpu.memory_space<vmem>>, vector<8x256xf32>
    %c0_2 = arith.constant 0 : index
    %c0_3 = arith.constant 0 : index
    %4 = vector.load %arg3[%c0_2, %c0_3] : memref<16x8xbf16, #tpu.memory_space<vmem>>, vector<16x8xbf16>
    %c0_4 = arith.constant 0 : index
    %c0_5 = arith.constant 0 : index
    %c0_6 = arith.constant 0 : index
    %5 = vector.load %arg2[%c0_4, %c0_5, %c0_6] : memref<1x16x256xbf16, #tpu.memory_space<vmem>>, vector<1x16x256xbf16>
    %6 = vector.shape_cast %5 : vector<1x16x256xbf16> to vector<16x256xbf16>
    %cst = arith.constant dense<0.000000e+00> : vector<8x256xf32>
    %7 = tpu.matmul %4, %6, %cst {dimension_numbers = #tpu.dot_dimension_numbers<[0], [0], [1], [1], [0, 1, 1, 1], [], []>} : vector<16x8xbf16>, vector<16x256xbf16>, vector<8x256xf32> -> vector<8x256xf32>
    %8 = arith.addf %3, %7 : vector<8x256xf32>
    %c0_7 = arith.constant 0 : index
    %c0_8 = arith.constant 0 : index
    %9 = vector.load %arg20[%c0_7, %c0_8] : memref<8x256xf32, #tpu.memory_space<vmem>>, vector<8x256xf32>
    tpu.vector_store %arg20[%c0_7, %c0_8], %8 {strides = array<i32>} : memref<8x256xf32, #tpu.memory_space<vmem>>, vector<8x256xf32>,
    %c1_i32 = arith.constant 1 : i32
    %10 = arith.cmpi eq, %arg1, %c1_i32 : i32
    %11 = arith.extui %10 : i1 to i32
    %c0_i32_9 = arith.constant 0 : i32
    %12 = arith.cmpi ne, %11, %c0_i32_9 : i32
    scf.if %12 {
      %c0_10 = arith.constant 0 : index
      %c0_11 = arith.constant 0 : index
      %13 = vector.load %arg20[%c0_10, %c0_11] : memref<8x256xf32, #tpu.memory_space<vmem>>, vector<8x256xf32>
      %c0_12 = arith.constant 0 : index
      %c0_13 = arith.constant 0 : index
      %14 = vector.load %arg4[%c0_12, %c0_13] : memref<8x1xf32, #tpu.memory_space<vmem>>, vector<8x1xf32>
      %15 = vector.broadcast %14 : vector<8x1xf32> to vector<8x256xf32>
      %16 = arith.addf %13, %15 : vector<8x256xf32>
      %cst_14 = arith.constant 0.000000e+00 : f32
      %17 = vector.broadcast %cst_14 : f32 to vector<8x256xf32>
      %18 = arith.maximumf %16, %17 : vector<8x256xf32>
      %c0_15 = arith.constant 0 : index
      %c0_16 = arith.constant 0 : index
      %19 = vector.load %arg5[%c0_15, %c0_16] : memref<9x256xf32, #tpu.memory_space<vmem>>, vector<9x256xf32>
      %c68_i32 = arith.constant 68 : i32
      %20 = tpu.dynamic_rotate %18 by %c68_i32 dim 1 : vector<8x256xf32>, i32 -> vector<8x256xf32>
      %21 = vector.extract_strided_slice %19 {offsets = [0, 0], sizes = [1, 256], strides = [1, 1]} : vector<9x256xf32> to vector<1x256xf32>
      %22 = vector.broadcast %21 : vector<1x256xf32> to vector<8x256xf32>
      %23 = arith.mulf %20, %22 : vector<8x256xf32>
      %c64_i32 = arith.constant 64 : i32
      %24 = tpu.dynamic_rotate %18 by %c64_i32 dim 1 : vector<8x256xf32>, i32 -> vector<8x256xf32>
      %25 = vector.extract_strided_slice %19 {offsets = [1, 0], sizes = [1, 256], strides = [1, 1]} : vector<9x256xf32> to vector<1x256xf32>
      %26 = vector.broadcast %25 : vector<1x256xf32> to vector<8x256xf32>
      %27 = arith.mulf %24, %26 : vector<8x256xf32>
      %c60_i32 = arith.constant 60 : i32
      %28 = tpu.dynamic_rotate %18 by %c60_i32 dim 1 : vector<8x256xf32>, i32 -> vector<8x256xf32>
      %29 = vector.extract_strided_slice %19 {offsets = [2, 0], sizes = [1, 256], strides = [1, 1]} : vector<9x256xf32> to vector<1x256xf32>
      %30 = vector.broadcast %29 : vector<1x256xf32> to vector<8x256xf32>
      %31 = arith.mulf %28, %30 : vector<8x256xf32>
      %c4_i32 = arith.constant 4 : i32
      %32 = tpu.dynamic_rotate %18 by %c4_i32 dim 1 : vector<8x256xf32>, i32 -> vector<8x256xf32>
      %33 = vector.extract_strided_slice %19 {offsets = [3, 0], sizes = [1, 256], strides = [1, 1]} : vector<9x256xf32> to vector<1x256xf32>
      %34 = vector.broadcast %33 : vector<1x256xf32> to vector<8x256xf32>
      %35 = arith.mulf %32, %34 : vector<8x256xf32>
      %36 = vector.extract_strided_slice %19 {offsets = [4, 0], sizes = [1, 256], strides = [1, 1]} : vector<9x256xf32> to vector<1x256xf32>
      %37 = vector.broadcast %36 : vector<1x256xf32> to vector<8x256xf32>
      %38 = arith.mulf %18, %37 : vector<8x256xf32>
      %c252_i32 = arith.constant 252 : i32
      %39 = tpu.dynamic_rotate %18 by %c252_i32 dim 1 : vector<8x256xf32>, i32 -> vector<8x256xf32>
      %40 = vector.extract_strided_slice %19 {offsets = [5, 0], sizes = [1, 256], strides = [1, 1]} : vector<9x256xf32> to vector<1x256xf32>
      %41 = vector.broadcast %40 : vector<1x256xf32> to vector<8x256xf32>
      %42 = arith.mulf %39, %41 : vector<8x256xf32>
      %c196_i32 = arith.constant 196 : i32
      %43 = tpu.dynamic_rotate %18 by %c196_i32 dim 1 : vector<8x256xf32>, i32 -> vector<8x256xf32>
      %44 = vector.extract_strided_slice %19 {offsets = [6, 0], sizes = [1, 256], strides = [1, 1]} : vector<9x256xf32> to vector<1x256xf32>
      %45 = vector.broadcast %44 : vector<1x256xf32> to vector<8x256xf32>
      %46 = arith.mulf %43, %45 : vector<8x256xf32>
      %c192_i32 = arith.constant 192 : i32
      %47 = tpu.dynamic_rotate %18 by %c192_i32 dim 1 : vector<8x256xf32>, i32 -> vector<8x256xf32>
      %48 = vector.extract_strided_slice %19 {offsets = [7, 0], sizes = [1, 256], strides = [1, 1]} : vector<9x256xf32> to vector<1x256xf32>
      %49 = vector.broadcast %48 : vector<1x256xf32> to vector<8x256xf32>
      %50 = arith.mulf %47, %49 : vector<8x256xf32>
      %c188_i32 = arith.constant 188 : i32
      %51 = tpu.dynamic_rotate %18 by %c188_i32 dim 1 : vector<8x256xf32>, i32 -> vector<8x256xf32>
      %52 = vector.extract_strided_slice %19 {offsets = [8, 0], sizes = [1, 256], strides = [1, 1]} : vector<9x256xf32> to vector<1x256xf32>
      %53 = vector.broadcast %52 : vector<1x256xf32> to vector<8x256xf32>
      %54 = arith.mulf %51, %53 : vector<8x256xf32>
      %55 = tpu.concatenate %23, %27, %31, %35, %38, %42, %46, %50, %54 in 0 : vector<8x256xf32>, vector<8x256xf32>, vector<8x256xf32>, vector<8x256xf32>, vector<8x256xf32>, vector<8x256xf32>, vector<8x256xf32>, vector<8x256xf32>, vector<8x256xf32> -> vector<72x256xf32>
      %56 = arith.truncf %55 : vector<72x256xf32> to vector<72x256xbf16>
      %c0_17 = arith.constant 0 : index
      %c0_18 = arith.constant 0 : index
      %57 = vector.load %arg6[%c0_17, %c0_18] : memref<8x72xbf16, #tpu.memory_space<vmem>>, vector<8x72xbf16>
      %cst_19 = arith.constant dense<0.000000e+00> : vector<8x256xf32>
      %58 = tpu.matmul %57, %56, %cst_19 {dimension_numbers = #tpu.dot_dimension_numbers<[1], [0], [0], [1], [0, 0, 1, 1], [], []>} : vector<8x72xbf16>, vector<72x256xbf16>, vector<8x256xf32> -> vector<8x256xf32>
      %c0_20 = arith.constant 0 : index
      %c0_21 = arith.constant 0 : index
      %59 = vector.load %arg7[%c0_20, %c0_21] : memref<8x1xf32, #tpu.memory_space<vmem>>, vector<8x1xf32>
      %60 = vector.broadcast %59 : vector<8x1xf32> to vector<8x256xf32>
      %61 = arith.addf %58, %60 : vector<8x256xf32>
      %cst_22 = arith.constant 0.000000e+00 : f32
      %62 = vector.broadcast %cst_22 : f32 to vector<8x256xf32>
      %63 = arith.maximumf %61, %62 : vector<8x256xf32>
      %c255_i32 = arith.constant 255 : i32
      %64 = tpu.dynamic_rotate %63 by %c255_i32 dim 1 : vector<8x256xf32>, i32 -> vector<8x256xf32>
      %65 = arith.maximumf %63, %64 : vector<8x256xf32>
      %c240_i32 = arith.constant 240 : i32
      %66 = tpu.dynamic_rotate %65 by %c240_i32 dim 1 : vector<8x256xf32>, i32 -> vector<8x256xf32>
      %67 = arith.maximumf %65, %66 : vector<8x256xf32>
      %c0_23 = arith.constant 0 : index
      %c0_24 = arith.constant 0 : index
      %68 = vector.load %arg8[%c0_23, %c0_24] : memref<9x256xf32, #tpu.memory_space<vmem>>, vector<9x256xf32>
      %c136_i32 = arith.constant 136 : i32
      %69 = tpu.dynamic_rotate %67 by %c136_i32 dim 1 : vector<8x256xf32>, i32 -> vector<8x256xf32>
      %70 = vector.extract_strided_slice %68 {offsets = [0, 0], sizes = [1, 256], strides = [1, 1]} : vector<9x256xf32> to vector<1x256xf32>
      %71 = vector.broadcast %70 : vector<1x256xf32> to vector<8x256xf32>
      %72 = arith.mulf %69, %71 : vector<8x256xf32>
      %c128_i32 = arith.constant 128 : i32
      %73 = tpu.dynamic_rotate %67 by %c128_i32 dim 1 : vector<8x256xf32>, i32 -> vector<8x256xf32>
      %74 = vector.extract_strided_slice %68 {offsets = [1, 0], sizes = [1, 256], strides = [1, 1]} : vector<9x256xf32> to vector<1x256xf32>
      %75 = vector.broadcast %74 : vector<1x256xf32> to vector<8x256xf32>
      %76 = arith.mulf %73, %75 : vector<8x256xf32>
      %c120_i32 = arith.constant 120 : i32
      %77 = tpu.dynamic_rotate %67 by %c120_i32 dim 1 : vector<8x256xf32>, i32 -> vector<8x256xf32>
      %78 = vector.extract_strided_slice %68 {offsets = [2, 0], sizes = [1, 256], strides = [1, 1]} : vector<9x256xf32> to vector<1x256xf32>
      %79 = vector.broadcast %78 : vector<1x256xf32> to vector<8x256xf32>
      %80 = arith.mulf %77, %79 : vector<8x256xf32>
      %c8_i32 = arith.constant 8 : i32
      %81 = tpu.dynamic_rotate %67 by %c8_i32 dim 1 : vector<8x256xf32>, i32 -> vector<8x256xf32>
      %82 = vector.extract_strided_slice %68 {offsets = [3, 0], sizes = [1, 256], strides = [1, 1]} : vector<9x256xf32> to vector<1x256xf32>
      %83 = vector.broadcast %82 : vector<1x256xf32> to vector<8x256xf32>
      %84 = arith.mulf %81, %83 : vector<8x256xf32>
      %85 = vector.extract_strided_slice %68 {offsets = [4, 0], sizes = [1, 256], strides = [1, 1]} : vector<9x256xf32> to vector<1x256xf32>
      %86 = vector.broadcast %85 : vector<1x256xf32> to vector<8x256xf32>
      %87 = arith.mulf %67, %86 : vector<8x256xf32>
      %c248_i32 = arith.constant 248 : i32
      %88 = tpu.dynamic_rotate %67 by %c248_i32 dim 1 : vector<8x256xf32>, i32 -> vector<8x256xf32>
      %89 = vector.extract_strided_slice %68 {offsets = [5, 0], sizes = [1, 256], strides = [1, 1]} : vector<9x256xf32> to vector<1x256xf32>
      %90 = vector.broadcast %89 : vector<1x256xf32> to vector<8x256xf32>
      %91 = arith.mulf %88, %90 : vector<8x256xf32>
      %c136_i32_25 = arith.constant 136 : i32
      %92 = tpu.dynamic_rotate %67 by %c136_i32_25 dim 1 : vector<8x256xf32>, i32 -> vector<8x256xf32>
      %93 = vector.extract_strided_slice %68 {offsets = [6, 0], sizes = [1, 256], strides = [1, 1]} : vector<9x256xf32> to vector<1x256xf32>
      %94 = vector.broadcast %93 : vector<1x256xf32> to vector<8x256xf32>
      %95 = arith.mulf %92, %94 : vector<8x256xf32>
      %c128_i32_26 = arith.constant 128 : i32
      %96 = tpu.dynamic_rotate %67 by %c128_i32_26 dim 1 : vector<8x256xf32>, i32 -> vector<8x256xf32>
      %97 = vector.extract_strided_slice %68 {offsets = [7, 0], sizes = [1, 256], strides = [1, 1]} : vector<9x256xf32> to vector<1x256xf32>
      %98 = vector.broadcast %97 : vector<1x256xf32> to vector<8x256xf32>
      %99 = arith.mulf %96, %98 : vector<8x256xf32>
      %c120_i32_27 = arith.constant 120 : i32
      %100 = tpu.dynamic_rotate %67 by %c120_i32_27 dim 1 : vector<8x256xf32>, i32 -> vector<8x256xf32>
      %101 = vector.extract_strided_slice %68 {offsets = [8, 0], sizes = [1, 256], strides = [1, 1]} : vector<9x256xf32> to vector<1x256xf32>
      %102 = vector.broadcast %101 : vector<1x256xf32> to vector<8x256xf32>
      %103 = arith.mulf %100, %102 : vector<8x256xf32>
      %104 = tpu.concatenate %72, %76, %80, %84, %87, %91, %95, %99, %103 in 0 : vector<8x256xf32>, vector<8x256xf32>, vector<8x256xf32>, vector<8x256xf32>, vector<8x256xf32>, vector<8x256xf32>, vector<8x256xf32>, vector<8x256xf32>, vector<8x256xf32> -> vector<72x256xf32>
      %105 = arith.truncf %104 : vector<72x256xf32> to vector<72x256xbf16>
      %c0_28 = arith.constant 0 : index
      %c0_29 = arith.constant 0 : index
      %106 = vector.load %arg9[%c0_28, %c0_29] : memref<8x72xbf16, #tpu.memory_space<vmem>>, vector<8x72xbf16>
      %cst_30 = arith.constant dense<0.000000e+00> : vector<8x256xf32>
      %107 = tpu.matmul %106, %105, %cst_30 {dimension_numbers = #tpu.dot_dimension_numbers<[1], [0], [0], [1], [0, 0, 1, 1], [], []>} : vector<8x72xbf16>, vector<72x256xbf16>, vector<8x256xf32> -> vector<8x256xf32>
      %c0_31 = arith.constant 0 : index
      %c0_32 = arith.constant 0 : index
      %108 = vector.load %arg10[%c0_31, %c0_32] : memref<8x1xf32, #tpu.memory_space<vmem>>, vector<8x1xf32>
      %109 = vector.broadcast %108 : vector<8x1xf32> to vector<8x256xf32>
      %110 = arith.addf %107, %109 : vector<8x256xf32>
      %cst_33 = arith.constant 0.000000e+00 : f32
      %111 = vector.broadcast %cst_33 : f32 to vector<8x256xf32>
      %112 = arith.maximumf %110, %111 : vector<8x256xf32>
      %c254_i32 = arith.constant 254 : i32
      %113 = tpu.dynamic_rotate %112 by %c254_i32 dim 1 : vector<8x256xf32>, i32 -> vector<8x256xf32>
      %114 = arith.maximumf %112, %113 : vector<8x256xf32>
      %c224_i32 = arith.constant 224 : i32
      %115 = tpu.dynamic_rotate %114 by %c224_i32 dim 1 : vector<8x256xf32>, i32 -> vector<8x256xf32>
      %116 = arith.maximumf %114, %115 : vector<8x256xf32>
      %c0_34 = arith.constant 0 : index
      %c0_35 = arith.constant 0 : index
      %117 = vector.load %arg12[%c0_34, %c0_35] : memref<32x8xbf16, #tpu.memory_space<vmem>>, vector<32x8xbf16>
      %118 = arith.truncf %116 : vector<8x256xf32> to vector<8x256xbf16>
      %cst_36 = arith.constant dense<0.000000e+00> : vector<32x256xf32>
      %119 = tpu.matmul %117, %118, %cst_36 {dimension_numbers = #tpu.dot_dimension_numbers<[1], [0], [0], [1], [0, 0, 1, 1], [], []>} : vector<32x8xbf16>, vector<8x256xbf16>, vector<32x256xf32> -> vector<32x256xf32>
      %c0_37 = arith.constant 0 : index
      %c0_38 = arith.constant 0 : index
      %120 = vector.load %arg11[%c0_37, %c0_38] : memref<4x256xf32, #tpu.memory_space<vmem>>, vector<4x256xf32>
      %cst_39 = arith.constant 0.000000e+00 : f32
      %121 = vector.broadcast %cst_39 : f32 to vector<8x256xf32>
      %122 = vector.extract_strided_slice %119 {offsets = [0, 0], sizes = [8, 256], strides = [1, 1]} : vector<32x256xf32> to vector<8x256xf32>
      %123 = vector.extract_strided_slice %120 {offsets = [0, 0], sizes = [1, 256], strides = [1, 1]} : vector<4x256xf32> to vector<1x256xf32>
      %124 = vector.broadcast %123 : vector<1x256xf32> to vector<8x256xf32>
      %125 = arith.mulf %122, %124 : vector<8x256xf32>
      %126 = arith.addf %121, %125 : vector<8x256xf32>
      %127 = vector.extract_strided_slice %119 {offsets = [8, 0], sizes = [8, 256], strides = [1, 1]} : vector<32x256xf32> to vector<8x256xf32>
      %c2_i32 = arith.constant 2 : i32
      %128 = tpu.dynamic_rotate %127 by %c2_i32 dim 1 : vector<8x256xf32>, i32 -> vector<8x256xf32>
      %129 = vector.extract_strided_slice %120 {offsets = [1, 0], sizes = [1, 256], strides = [1, 1]} : vector<4x256xf32> to vector<1x256xf32>
      %130 = vector.broadcast %129 : vector<1x256xf32> to vector<8x256xf32>
      %131 = arith.mulf %128, %130 : vector<8x256xf32>
      %132 = arith.addf %126, %131 : vector<8x256xf32>
      %133 = vector.extract_strided_slice %119 {offsets = [16, 0], sizes = [8, 256], strides = [1, 1]} : vector<32x256xf32> to vector<8x256xf32>
      %c32_i32 = arith.constant 32 : i32
      %134 = tpu.dynamic_rotate %133 by %c32_i32 dim 1 : vector<8x256xf32>, i32 -> vector<8x256xf32>
      %135 = vector.extract_strided_slice %120 {offsets = [2, 0], sizes = [1, 256], strides = [1, 1]} : vector<4x256xf32> to vector<1x256xf32>
      %136 = vector.broadcast %135 : vector<1x256xf32> to vector<8x256xf32>
      %137 = arith.mulf %134, %136 : vector<8x256xf32>
      %138 = arith.addf %132, %137 : vector<8x256xf32>
      %139 = vector.extract_strided_slice %119 {offsets = [24, 0], sizes = [8, 256], strides = [1, 1]} : vector<32x256xf32> to vector<8x256xf32>
      %c34_i32 = arith.constant 34 : i32
      %140 = tpu.dynamic_rotate %139 by %c34_i32 dim 1 : vector<8x256xf32>, i32 -> vector<8x256xf32>
      %141 = vector.extract_strided_slice %120 {offsets = [3, 0], sizes = [1, 256], strides = [1, 1]} : vector<4x256xf32> to vector<1x256xf32>
      %142 = vector.broadcast %141 : vector<1x256xf32> to vector<8x256xf32>
      %143 = arith.mulf %140, %142 : vector<8x256xf32>
      %144 = arith.addf %138, %143 : vector<8x256xf32>
      %c0_40 = arith.constant 0 : index
      %c0_41 = arith.constant 0 : index
      %145 = vector.load %arg13[%c0_40, %c0_41] : memref<8x1xf32, #tpu.memory_space<vmem>>, vector<8x1xf32>
      %146 = vector.broadcast %145 : vector<8x1xf32> to vector<8x256xf32>
      %147 = arith.addf %144, %146 : vector<8x256xf32>
      %cst_42 = arith.constant 0.000000e+00 : f32
      %148 = vector.broadcast %cst_42 : f32 to vector<8x256xf32>
      %149 = arith.maximumf %147, %148 : vector<8x256xf32>
      %c0_43 = arith.constant 0 : index
      %c0_44 = arith.constant 0 : index
      %150 = vector.load %arg15[%c0_43, %c0_44] : memref<32x8xbf16, #tpu.memory_space<vmem>>, vector<32x8xbf16>
      %151 = arith.truncf %149 : vector<8x256xf32> to vector<8x256xbf16>
      %cst_45 = arith.constant dense<0.000000e+00> : vector<32x256xf32>
      %152 = tpu.matmul %150, %151, %cst_45 {dimension_numbers = #tpu.dot_dimension_numbers<[1], [0], [0], [1], [0, 0, 1, 1], [], []>} : vector<32x8xbf16>, vector<8x256xbf16>, vector<32x256xf32> -> vector<32x256xf32>
      %c0_46 = arith.constant 0 : index
      %c0_47 = arith.constant 0 : index
      %153 = vector.load %arg14[%c0_46, %c0_47] : memref<4x256xf32, #tpu.memory_space<vmem>>, vector<4x256xf32>
      %cst_48 = arith.constant 0.000000e+00 : f32
      %154 = vector.broadcast %cst_48 : f32 to vector<8x256xf32>
      %155 = vector.extract_strided_slice %152 {offsets = [0, 0], sizes = [8, 256], strides = [1, 1]} : vector<32x256xf32> to vector<8x256xf32>
      %156 = vector.extract_strided_slice %153 {offsets = [0, 0], sizes = [1, 256], strides = [1, 1]} : vector<4x256xf32> to vector<1x256xf32>
      %157 = vector.broadcast %156 : vector<1x256xf32> to vector<8x256xf32>
      %158 = arith.mulf %155, %157 : vector<8x256xf32>
      %159 = arith.addf %154, %158 : vector<8x256xf32>
      %160 = vector.extract_strided_slice %152 {offsets = [8, 0], sizes = [8, 256], strides = [1, 1]} : vector<32x256xf32> to vector<8x256xf32>
      %c1_i32_49 = arith.constant 1 : i32
      %161 = tpu.dynamic_rotate %160 by %c1_i32_49 dim 1 : vector<8x256xf32>, i32 -> vector<8x256xf32>
      %162 = vector.extract_strided_slice %153 {offsets = [1, 0], sizes = [1, 256], strides = [1, 1]} : vector<4x256xf32> to vector<1x256xf32>
      %163 = vector.broadcast %162 : vector<1x256xf32> to vector<8x256xf32>
      %164 = arith.mulf %161, %163 : vector<8x256xf32>
      %165 = arith.addf %159, %164 : vector<8x256xf32>
      %166 = vector.extract_strided_slice %152 {offsets = [16, 0], sizes = [8, 256], strides = [1, 1]} : vector<32x256xf32> to vector<8x256xf32>
      %c16_i32 = arith.constant 16 : i32
      %167 = tpu.dynamic_rotate %166 by %c16_i32 dim 1 : vector<8x256xf32>, i32 -> vector<8x256xf32>
      %168 = vector.extract_strided_slice %153 {offsets = [2, 0], sizes = [1, 256], strides = [1, 1]} : vector<4x256xf32> to vector<1x256xf32>
      %169 = vector.broadcast %168 : vector<1x256xf32> to vector<8x256xf32>
      %170 = arith.mulf %167, %169 : vector<8x256xf32>
      %171 = arith.addf %165, %170 : vector<8x256xf32>
      %172 = vector.extract_strided_slice %152 {offsets = [24, 0], sizes = [8, 256], strides = [1, 1]} : vector<32x256xf32> to vector<8x256xf32>
      %c17_i32 = arith.constant 17 : i32
      %173 = tpu.dynamic_rotate %172 by %c17_i32 dim 1 : vector<8x256xf32>, i32 -> vector<8x256xf32>
      %174 = vector.extract_strided_slice %153 {offsets = [3, 0], sizes = [1, 256], strides = [1, 1]} : vector<4x256xf32> to vector<1x256xf32>
      %175 = vector.broadcast %174 : vector<1x256xf32> to vector<8x256xf32>
      %176 = arith.mulf %173, %175 : vector<8x256xf32>
      %177 = arith.addf %171, %176 : vector<8x256xf32>
      %c0_50 = arith.constant 0 : index
      %c0_51 = arith.constant 0 : index
      %178 = vector.load %arg16[%c0_50, %c0_51] : memref<8x1xf32, #tpu.memory_space<vmem>>, vector<8x1xf32>
      %179 = vector.broadcast %178 : vector<8x1xf32> to vector<8x256xf32>
      %180 = arith.addf %177, %179 : vector<8x256xf32>
      %cst_52 = arith.constant 0.000000e+00 : f32
      %181 = vector.broadcast %cst_52 : f32 to vector<8x256xf32>
      %182 = arith.maximumf %180, %181 : vector<8x256xf32>
      %c0_53 = arith.constant 0 : index
      %c0_54 = arith.constant 0 : index
      %183 = vector.load %arg17[%c0_53, %c0_54] : memref<1x8xbf16, #tpu.memory_space<vmem>>, vector<1x8xbf16>
      %184 = arith.truncf %182 : vector<8x256xf32> to vector<8x256xbf16>
      %cst_55 = arith.constant dense<0.000000e+00> : vector<1x256xf32>
      %185 = tpu.matmul %183, %184, %cst_55 {dimension_numbers = #tpu.dot_dimension_numbers<[1], [0], [0], [1], [0, 0, 1, 1], [], []>} : vector<1x8xbf16>, vector<8x256xbf16>, vector<1x256xf32> -> vector<1x256xf32>
      %c0_56 = arith.constant 0 : index
      %c0_57 = arith.constant 0 : index
      %186 = vector.load %arg18[%c0_56, %c0_57] : memref<1x1xf32, #tpu.memory_space<vmem>>, vector<1x1xf32>
      %187 = vector.broadcast %186 : vector<1x1xf32> to vector<1x256xf32>
      %188 = arith.addf %185, %187 : vector<1x256xf32>
      %c0_58 = arith.constant 0 : index
      %c0_59 = arith.constant 0 : index
      %c0_60 = arith.constant 0 : index
      %189 = vector.load %arg19[%c0_58, %c0_59, %c0_60] : memref<1x1x256xf32, #tpu.memory_space<vmem>>, vector<1x1x256xf32>
      %190 = vector.shape_cast %189 : vector<1x1x256xf32> to vector<1x256xf32>
      %191 = vector.shape_cast %188 : vector<1x256xf32> to vector<1x1x256xf32>
      tpu.vector_store %arg19[%c0_58, %c0_59, %c0_60], %191 {strides = array<i32>} : memref<1x1x256xf32, #tpu.memory_space<vmem>>, vector<1x1x256xf32>,
    } else {
    }
    return
  }
  func.func @transform_0(%arg0: i32, %arg1: i32) -> (i32, i32, i32) {
    %c0_i32 = arith.constant 0 : i32
    %c0_i32_0 = arith.constant 0 : i32
    return %arg0, %arg1, %c0_i32 : i32, i32, i32
  }
  func.func @transform_1(%arg0: i32, %arg1: i32) -> (i32, i32) {
    %c0_i32 = arith.constant 0 : i32
    %c0_i32_0 = arith.constant 0 : i32
    return %arg1, %c0_i32 : i32, i32
  }
  func.func @transform_2(%arg0: i32, %arg1: i32) -> (i32, i32) {
    %c0_i32 = arith.constant 0 : i32
    %c0_i32_0 = arith.constant 0 : i32
    %c0_i32_1 = arith.constant 0 : i32
    return %c0_i32, %c0_i32_0 : i32, i32
  }
  func.func @transform_3(%arg0: i32, %arg1: i32) -> (i32, i32) {
    %c0_i32 = arith.constant 0 : i32
    %c0_i32_0 = arith.constant 0 : i32
    %c0_i32_1 = arith.constant 0 : i32
    return %c0_i32, %c0_i32_0 : i32, i32
  }
  func.func @transform_4(%arg0: i32, %arg1: i32) -> (i32, i32) {
    %c0_i32 = arith.constant 0 : i32
    %c0_i32_0 = arith.constant 0 : i32
    %c0_i32_1 = arith.constant 0 : i32
    return %c0_i32, %c0_i32_0 : i32, i32
  }
  func.func @transform_5(%arg0: i32, %arg1: i32) -> (i32, i32) {
    %c0_i32 = arith.constant 0 : i32
    %c0_i32_0 = arith.constant 0 : i32
    %c0_i32_1 = arith.constant 0 : i32
    return %c0_i32, %c0_i32_0 : i32, i32
  }
  func.func @transform_6(%arg0: i32, %arg1: i32) -> (i32, i32) {
    %c0_i32 = arith.constant 0 : i32
    %c0_i32_0 = arith.constant 0 : i32
    %c0_i32_1 = arith.constant 0 : i32
    return %c0_i32, %c0_i32_0 : i32, i32
  }
  func.func @transform_7(%arg0: i32, %arg1: i32) -> (i32, i32) {
    %c0_i32 = arith.constant 0 : i32
    %c0_i32_0 = arith.constant 0 : i32
    %c0_i32_1 = arith.constant 0 : i32
    return %c0_i32, %c0_i32_0 : i32, i32
  }
  func.func @transform_8(%arg0: i32, %arg1: i32) -> (i32, i32) {
    %c0_i32 = arith.constant 0 : i32
    %c0_i32_0 = arith.constant 0 : i32
    %c0_i32_1 = arith.constant 0 : i32
    return %c0_i32, %c0_i32_0 : i32, i32
  }
  func.func @transform_9(%arg0: i32, %arg1: i32) -> (i32, i32) {
    %c0_i32 = arith.constant 0 : i32
    %c0_i32_0 = arith.constant 0 : i32
    %c0_i32_1 = arith.constant 0 : i32
    return %c0_i32, %c0_i32_0 : i32, i32
  }
  func.func @transform_10(%arg0: i32, %arg1: i32) -> (i32, i32) {
    %c0_i32 = arith.constant 0 : i32
    %c0_i32_0 = arith.constant 0 : i32
    %c0_i32_1 = arith.constant 0 : i32
    return %c0_i32, %c0_i32_0 : i32, i32
  }
  func.func @transform_11(%arg0: i32, %arg1: i32) -> (i32, i32) {
    %c0_i32 = arith.constant 0 : i32
    %c0_i32_0 = arith.constant 0 : i32
    %c0_i32_1 = arith.constant 0 : i32
    return %c0_i32, %c0_i32_0 : i32, i32
  }
  func.func @transform_12(%arg0: i32, %arg1: i32) -> (i32, i32) {
    %c0_i32 = arith.constant 0 : i32
    %c0_i32_0 = arith.constant 0 : i32
    %c0_i32_1 = arith.constant 0 : i32
    return %c0_i32, %c0_i32_0 : i32, i32
  }
  func.func @transform_13(%arg0: i32, %arg1: i32) -> (i32, i32) {
    %c0_i32 = arith.constant 0 : i32
    %c0_i32_0 = arith.constant 0 : i32
    %c0_i32_1 = arith.constant 0 : i32
    return %c0_i32, %c0_i32_0 : i32, i32
  }
  func.func @transform_14(%arg0: i32, %arg1: i32) -> (i32, i32) {
    %c0_i32 = arith.constant 0 : i32
    %c0_i32_0 = arith.constant 0 : i32
    %c0_i32_1 = arith.constant 0 : i32
    return %c0_i32, %c0_i32_0 : i32, i32
  }
  func.func @transform_15(%arg0: i32, %arg1: i32) -> (i32, i32) {
    %c0_i32 = arith.constant 0 : i32
    %c0_i32_0 = arith.constant 0 : i32
    %c0_i32_1 = arith.constant 0 : i32
    return %c0_i32, %c0_i32_0 : i32, i32
  }
  func.func @transform_16(%arg0: i32, %arg1: i32) -> (i32, i32) {
    %c0_i32 = arith.constant 0 : i32
    %c0_i32_0 = arith.constant 0 : i32
    %c0_i32_1 = arith.constant 0 : i32
    return %c0_i32, %c0_i32_0 : i32, i32
  }
  func.func @transform_17(%arg0: i32, %arg1: i32) -> (i32, i32, i32) {
    %c0_i32 = arith.constant 0 : i32
    %c0_i32_0 = arith.constant 0 : i32
    %c0_i32_1 = arith.constant 0 : i32
    return %arg0, %c0_i32, %c0_i32_0 : i32, i32, i32
  }
}

</mosaic_0001>

<bundles_post_ra>
// kernel: spatial_gate_forward.1
= control target key start
LH: loop header
LB: loop body
LE: loop exit
PB: predicated region body
PF: predicated region fallthrough
CT: control target
= control target key end

     0   :  { %s1978_s26 = smov 0   ;;  %s1980_s27 = smov 0   ;;  %s2304_s0 = inlined_call_operand.vmem [shape: bf16[2,32,256], index: 0, kind: input, shape index: {}]   ;;  %s2305_s1 = inlined_call_operand.vmem [shape: bf16[32,8], index: 1, kind: input, shape index: {}]   ;;  %s2306_s2 = inlined_call_operand.vmem [shape: f32[8,1], index: 2, kind: input, shape index: {}]   ;;  %s2307_s3 = inlined_call_operand.vmem [shape: f32[9,256], index: 3, kind: input, shape index: {}]   ;;  %s2308_s4 = inlined_call_operand.vmem [shape: bf16[8,72], index: 4, kind: input, shape index: {}]   ;;  %s2309_s5 = inlined_call_operand.vmem [shape: f32[8,1], index: 5, kind: input, shape index: {}]   ;;  %s2310_s6 = inlined_call_operand.vmem [shape: f32[9,256], index: 6, kind: input, shape index: {}]   ;;  %s2311_s7 = inlined_call_operand.vmem [shape: bf16[8,72], index: 7, kind: input, shape index: {}]   ;;  %s2312_s8 = inlined_call_operand.vmem [shape: f32[8,1], index: 8, kind: input, shape index: {}]   ;;  %s2313_s9 = inlined_call_operand.vmem [shape: f32[4,256], index: 9, kind: input, shape index: {}]   ;;  %s2314_s10 = inlined_call_operand.vmem [shape: bf16[32,8], index: 10, kind: input, shape index: {}]   ;;  %s2315_s11 = inlined_call_operand.vmem [shape: f32[8,1], index: 11, kind: input, shape index: {}]   ;;  %s2316_s12 = inlined_call_operand.vmem [shape: f32[4,256], index: 12, kind: input, shape index: {}]   ;;  %s2317_s13 = inlined_call_operand.vmem [shape: bf16[32,8], index: 13, kind: input, shape index: {}]   ;;  %s2318_s14 = inlined_call_operand.vmem [shape: f32[8,1], index: 14, kind: input, shape index: {}]   ;;  %s2319_s15 = inlined_call_operand.vmem [shape: bf16[1,8], index: 15, kind: input, shape index: {}]   ;;  %s2320_s16 = inlined_call_operand.<no memory space> [shape: f32[1,1], index: 16, kind: input, shape index: {}]   ;;  %s2321_s17 = inlined_call_operand.vmem [shape: f32[2,1,256], index: 17, kind: output, shape index: {}]  }
   0x1   :  { %2326 = sst [smem:[#allocation9_spill]] %s2304_s0  ;;  %v22_v0 = vstv %s2320_s16  ;;  %s1982_s28 = smov 0  }
   0x2   :  { %2327 = sst [smem:[#allocation10_spill]] %s2305_s1  ;;  %23 = vst [vmem:[#allocation3] sm:$0x1] %v22_v0  ;;  %s1984_s29 = smov 0  }
   0x3   :  { %2328 = sst [smem:[#allocation11_spill]] %s2313_s9  ;;  %s1986_s0 = smov 0  }
   0x4   :  { %2329 = sst [smem:[#allocation12_spill]] %s2316_s12 }
   0x5   :  { %2330 = sst [smem:[#allocation13_spill]] %s2317_s13 }
   0x6   :  { %2331 = sst [smem:[#allocation14_spill]] %s2319_s15 }
   0x7 LB: > { %2332 = sst [smem:[#allocation4_spill]] %s1854_s28  ;;  %s38_s16 = sadd.s32 1, %s1854_s28  ;;  %s1862_s0 = sphi %s1986_s0, %s29_s0   ;;  %s1858_s29 = sphi %s1984_s29, %s2347_s29   ;;  %s1854_s28 = sphi %s1982_s28, %s2346_s28   ;;  %s1850_s27 = sphi %s1980_s27, %s2345_s27   ;;  %s1846_s26 = sphi %s1978_s26, %s2344_s26  }
   0x8   : > { %2333 = sst [smem:[#allocation5_spill]] %s1858_s29  ;;  %s41_s30 = sadd.s32 1, %s1858_s29 }
   0x9   : > { %2334 = sst [smem:[#allocation6_spill]] %s1862_s0  ;;  %p39_p0 = scmp.ge.s32.totalorder %s38_s16, 2 }
   0xa   : > { %p1707_p1 = scmp.ge.s32.totalorder %s1862_s0, 1  ;;  %p520_p2 = scmp.lt.s32.totalorder %s1862_s0, 5 }
   0xb   : > { %s2349_s16 = smov (%p39_p0, %s38_s16), 0  ;;  %s2351_s30 = smov (!%p39_p0, %s41_s30), %s1858_s29 }
   0xc   : > { %2335 = sst [smem:[#allocation7_spill]] %s2349_s16  ;;  %p521_p3 = pnand %p1707_p1, %p520_p2 }
   0xd   : > { %p43_p4 = scmp.ge.s32.totalorder %s2351_s30, 2  ;;  %s1708_s18 = sshll.u32 (!%p521_p3), %s1846_s26, 1 }
   0xe   : > { %524 = sbr.rel (%p521_p3) target bundleno = 2504 (0x9c8), region = 88  ;;  %p582_p5 = scmp.lt.s32.totalorder (!%p521_p3), %s1850_s27, 1 }
   0xf   : > { %s2353_s30 = smov (%p43_p4, %s2351_s30), 0  ;;  %p584_p6 = scmp.lt.s32.totalorder (!%p521_p3), %s1708_s18, 3 }
  0x10   : > { %2336 = sst [smem:[#allocation8_spill]] %s2353_s30  ;;  %s2337_s25 = sld [smem:[#allocation10_spill]] (!%p521_p3) }
  0x11   : > { %s2338_s13 = sld [smem:[#allocation9_spill]] (!%p521_p3)  ;;  %p1715_p7 = scmp.ne.s32.totalorder (!%p521_p3), %s1846_s26, 0 }
  0x15   : > { %s2355_s27 = smov (!%p582_p5, %s1850_s27), 1  ;;  %s2357_s18 = smov (!%p584_p6, %s1708_s18), 3 }
  0x16   : > { %s1710_s19 = sshll.u32 %s2355_s27, 3  ;;  %s1714_s1 = sshll.u32 %s2355_s27, 1  ;;  %v1864_v1 = vmov (!%p1715_p7), 0.0  }
  0x17   : > { %s1709_s20 = sshll.u32 %s2357_s18, 1  ;;  %s1713_s21 = sshll.u32 %s2357_s18, 2  ;;  %607 = vst [vmem:[#allocation2] sm:$0xff] (!%p1715_p7), %v1864_v1  ;;  %608 = vst [vmem:[#allocation2 + $0x8] sm:$0xff] (!%p1715_p7), %v1864_v1 }
  0x18   : > { %s588_s22 = sadd.s32 %s1710_s19, %s1709_s20  ;;  %s596_s16 = scalar_lea.vmem %s2337_s25, %s1713_s21 }
  0x19   : > { %s1711_s29 = sshll.u32 %s588_s22, 2  ;;  %s2017_s30 = scalar_lea.vmem %s2321_s17, %s1714_s1 }
  0x1a   : > { %s590_s9 = scalar_lea.vmem %s2338_s13, %s1711_s29  ;;  %606 = sbr.rel (%p1715_p7) target bundleno = 33 (0x21), region = 92 }
  0x21 PF: > { %v1804_v2 = vld [vmem:[%s596_s16] sm:$0xff]   ;;  %v1865_v4 = vmov 0   ;;  %vm647_vm0 = vcmask 130048   ;;  %v610_v8 = vld [vmem:[#allocation2 + $0x8] sm:$0xff]  ;;  %p1720_p8 = scmp.ne.s32.totalorder %s1846_s26, 1 }
  0x22   : > { %v1805_v3 = vld [vmem:[%s590_s9 + $0x4] ss:$8 sps:$4 sm:$0xff]   ;;  %683 = vmatprep.mubr.bf16.mxu0 %v1865_v4  ;;  %621 = vxpose.xlu0.c.b16.start.end [1/1] (short) (narrow) %v1804_v2, 16  ;;  %v1807_v5 = vld [vmem:[%s590_s9] ss:$8 sps:$4 sm:$0xff]   ;;  %v1866_v16 = vmov (!%p1720_p8), 0   ;;  %v720_v25 = vlaneseq (!%p1720_p8) }
  0x23   : > { %651 = vmatprep.subr.bf16.mxu0 %v1805_v3  ;;  %v609_v7 = vld [vmem:[#allocation2] sm:$0xff]  ;;  %1809 = vset.pattern.permute.xlu1 (!%p1720_p8), %v1866_v16  ;;  %s1867_s13 = smov (!%p1720_p8), 68   ;;  %s1868_s15 = smov (!%p1720_p8), 64   ;;  %v2069_v33 = vld [vmem:[%s2307_s3 + $0x8] sm:$0xff] (!%p1720_p8)  ;;  %vm864_vm6 = vcmask (!%p1720_p8), 1043456   ;;  %vm860_vm7 = vcmask (!%p1720_p8), 588800  }
  0x24   : > { %652 = vmatpush1.bf16.msra.mxu0 %v1807_v5  ;;  %v702_v15 = vld [vmem:[%s2306_s2] sm:$0xff] (!%p1720_p8)  ;;  %1098 = vmatprep.mubr.bf16.mxu1 (!%p1720_p8), %v1866_v16  ;;  %s1869_s26 = smov (!%p1720_p8), 60   ;;  %s1870_s27 = smov (!%p1720_p8), 4   ;;  %v2049_v26 = vshrl.u32 (!%p1720_p8), %v720_v25, 7  ;;  %v2052_v27 = vand.u32 (!%p1720_p8), 127, %v720_v25  ;;  %vm1143_vm14 = vcmask (!%p1720_p8), 64512  }
  0x25   : > { %s1871_s28 = smov (!%p1720_p8), 124   ;;  %v854_v24 = vld [vmem:[%s2309_s5] sm:$0xff] (!%p1720_p8)  ;;  %s1872_s12 = smov (!%p1720_p8), 127  }
  0x26   : > { %v2055_v28 = vsub.s32 (!%p1720_p8), 0, %v2049_v26  ;;  %v2058_v29 = vsub.s32 (!%p1720_p8), 1, %v2049_v26  ;;  %v2063_v31 = vld [vmem:[%s2307_s3] sm:$0xff] (!%p1720_p8)  ;;  %vm722_vm1 = vcmp.lt.s32.totalorder (!%p1720_p8), %v2052_v27, 68  ;;  %vm739_vm2 = vcmp.lt.s32.totalorder (!%p1720_p8), %v2052_v27, 64  ;;  %s1873_s9 = smov (!%p1720_p8), 112  }
  0x27   : > { %v2083_v44 = vsub.s32 (!%p1720_p8), 2, %v2049_v26  ;;  %v2086_v45 = vsub.s32 (!%p1720_p8), 3, %v2049_v26  ;;  %v2090_v50 = vsub.s32 (!%p1720_p8), 4, %v2049_v26  ;;  %v2093_v51 = vsub.s32 (!%p1720_p8), 7, %v2049_v26  ;;  %s1876_s23 = smov (!%p1720_p8), 126   ;;  %s1880_s29 = smov (!%p1720_p8), 34  }
  0x28   : > { %v728_v34 = vrot.slane (!%p1720_p8), %v2063_v31, %v2055_v28  ;;  %v745_v35 = vrot.slane (!%p1720_p8), %v2063_v31, %v2058_v29  ;;  %v732_v36 = vrot.slane (!%p1720_p8), %v2069_v33, %v2055_v28  ;;  %v749_v37 = vrot.slane (!%p1720_p8), %v2069_v33, %v2058_v29  ;;  %s2339_s1 = sld [smem:[#allocation11_spill]] (!%p1720_p8)  ;;  %s2340_s22 = sld [smem:[#allocation13_spill]] (!%p1720_p8) }
  0x29   : > { %vm756_vm3 = vcmp.lt.s32.totalorder (!%p1720_p8), %v2052_v27, 60  ;;  %v762_v56 = vrot.slane (!%p1720_p8), %v2063_v31, %v2083_v44  ;;  %v2099_v57 = vsub.s32 (!%p1720_p8), 5, %v2049_v26  ;;  %v766_v58 = vrot.slane (!%p1720_p8), %v2069_v33, %v2083_v44  ;;  %s1881_s25 = smov (!%p1720_p8), 1  }
  0x2a   : > { %vm773_vm4 = vcmp.lt.s32.totalorder (!%p1720_p8), %v2052_v27, 4  ;;  %v779_v59 = vrot.slane (!%p1720_p8), %v2063_v31, %v2086_v45  ;;  %v783_v60 = vrot.slane (!%p1720_p8), %v2069_v33, %v2086_v45  ;;  %v793_v63 = vrot.slane (!%p1720_p8), %v2069_v33, %v2090_v50 }
  0x2b   : > { %1808 = vset.pattern.permute.xlu0 (!%p1720_p8), %v1866_v16  ;;  %v2111_v0 = vsub.s32 (!%p1720_p8), 6, %v2049_v26  ;;  %v830_v1 = vrot.slane (!%p1720_p8), %v2069_v33, %v2093_v51  ;;  %vm800_vm5 = vcmp.lt.s32.totalorder (!%p1720_p8), %v2052_v27, 124  ;;  %v789_v4 = vrot.slane (!%p1720_p8), %v2063_v31, %v2090_v50 }
  0x2c   : > { %705 = vperm.xlu0 (!%p1720_p8), %1808, %v702_v15   ;;  %vm918_vm8 = vcmp.lt.s32.totalorder (!%p1720_p8), %v2052_v27, 127  ;;  %vm927_vm9 = vcmp.lt.s32.totalorder (!%p1720_p8), %v2052_v27, 112  ;;  %vm940_vm10 = vcmp.lt.s32.totalorder (!%p1720_p8), %v2052_v27, 8  ;;  %vm967_vm11 = vcmp.lt.s32.totalorder (!%p1720_p8), %v2052_v27, 120 }
  0x2d   : > { %vm1113_vm12 = vcmp.lt.s32.totalorder (!%p1720_p8), %v2052_v27, 126  ;;  %vm1122_vm13 = vcmp.lt.s32.totalorder (!%p1720_p8), %v2052_v27, 96  ;;  %vm1237_vm15 = vcmp.lt.s32.totalorder (!%p1720_p8), %v2052_v27, 2 }
  0x88   : > { %v629_v6 = vpop.trf.xlu0 }
  0x89   : > { %1719 = vmatmul.mubr.msk.bf16.vlgmr.msra.gmra.mrb[0].mxu0 %vm647_vm0, %v629_v6  ;;  %vm1266_vm0 = vcmp.lt.s32.totalorder (!%p1720_p8), %v2052_v27, 32 }
  0x8a   : > { %903 = vmatprep.mubr.bf16.mxu0 (!%p1720_p8), %v1866_v16 }
  0xab   : > { %v706_v19 = vpop.permute.xlu0 (!%p1720_p8), %705 }
 0x15a   : > { %699 = sbr.rel (%p1720_p8) target bundleno = 2504 (0x9c8), region = 96 }
 0x15c   : > { %v685_v9 = vpop.f32.mrb[0].mxu0 }
 0x15d   : > { %v692_v10 = vadd.f32 %v685_v9, %v609_v7  ;;  %v687_v11 = vpop.f32.mrb[1].mxu0  ;;  %v806_v7 = vrot.slane (!%p1720_p8), %v2063_v31, %v2099_v57 }
 0x15e   : > { %v693_v12 = vadd.f32 %v687_v11, %v610_v8  ;;  %v689_v13 = vpop.f32.mrb[2].mxu0  ;;  %v810_v8 = vrot.slane (!%p1720_p8), %v2069_v33, %v2099_v57 }
 0x15f   : > { %694 = vst [vmem:[#allocation2] sm:$0xff] %v692_v10  ;;  %v690_v14 = vpop.f32.mrb[3].mxu0  ;;  %v820_v13 = vrot.slane (!%p1720_p8), %v2069_v33, %v2111_v0 }
 0x160   : > { %695 = vst [vmem:[#allocation2 + $0x8] sm:$0xff] %v693_v12 }
 0x166   : > { %v700_v17 = vld [vmem:[#allocation2] sm:$0xff] }
 0x167   : > { %v701_v18 = vld [vmem:[#allocation2 + $0x8] sm:$0xff]  ;;  %v708_v20 = vadd.f32 %v706_v19, %v700_v17 }
 0x168   : > { %v709_v21 = vadd.f32 %v706_v19, %v701_v18  ;;  %v826_v19 = vrot.slane %v2063_v31, %v2093_v51 }
 0x169   : > { %v2031_v22 = vmax.f32 %v708_v20, 0.0 }
 0x16a   : > { %v2033_v23 = vmax.f32 %v709_v21, 0.0 }
 0x16b   : > { %716 = vrot.lane.b32.xlu0 %v2031_v22, %s1867_s13  ;;  %v794_v33 = vmul.f32 %v789_v4, %v2031_v22 }
 0x16c   : > { %718 = vrot.lane.b32.xlu1 %v2033_v23, %s1867_s13  ;;  %s1874_s13 = smov 8  }
 0x16f   : > { %737 = vrot.lane.b32.xlu0 %v2033_v23, %s1868_s15 }
 0x170   : > { %735 = vrot.lane.b32.xlu1 %v2031_v22, %s1868_s15  ;;  %s1875_s15 = smov 120  }
 0x173   : > { %754 = vrot.lane.b32.xlu0 %v2033_v23, %s1869_s26 }
 0x174   : > { %752 = vrot.lane.b32.xlu1 %v2031_v22, %s1869_s26  ;;  %s2341_s26 = sld [smem:[#allocation12_spill]] }
 0x177   : > { %771 = vrot.lane.b32.xlu0 %v2033_v23, %s1870_s27 }
 0x178   : > { %769 = vrot.lane.b32.xlu1 %v2031_v22, %s1870_s27  ;;  %s1878_s27 = smov 2  }
 0x17b   : > { %798 = vrot.lane.b32.xlu0 %v2033_v23, %s1871_s28 }
 0x17c   : > { %796 = vrot.lane.b32.xlu1 %v2031_v22, %s1871_s28  ;;  %s1879_s28 = smov 32  }
 0x180   : > { %857 = vperm.xlu1 %1809, %v854_v24   ;;  %v795_v24 = vmul.f32 %v793_v63, %v2033_v23 }
 0x1dd   : > { %v717_v32 = vpop.permute.xlu0 %716 }
 0x1de   : > { %v719_v30 = vpop.permute.xlu1 %718 }
 0x1df   : > { %v2080_v38 = vsel %vm722_vm1, %v717_v32, %v719_v30  ;;  %v724_v39 = vsel %vm722_vm1, %v719_v30, %v717_v32  ;;  %vm1295_vm1 = vcmp.lt.s32.totalorder %v2052_v27, 34 }
 0x1e0   : > { %v733_v46 = vmul.f32 %v728_v34, %v724_v39  ;;  %v734_v48 = vmul.f32 %v732_v36, %v2080_v38  ;;  %v1721_v36 = vld [vmem:[%s2307_s3 + $0x10] ss:$0 sm:$0xff] }
 0x1e1   : > { %v738_v41 = vpop.permute.xlu0 %737 }
 0x1e2   : > { %v736_v40 = vpop.permute.xlu1 %735 }
 0x1e3   : > { %v740_v42 = vsel %vm739_vm2, %v736_v40, %v738_v41  ;;  %v741_v43 = vsel %vm739_vm2, %v738_v41, %v736_v40  ;;  %v822_v40 = vmul.f32 %v820_v13, %v724_v39  ;;  %v933_v13 = vld [vmem:[%s2310_s6 + $0x8] sm:$0xff]  ;;  %vm1439_vm2 = vcmp.lt.s32.totalorder %v2052_v27, 1 }
 0x1e4   : > { %v750_v47 = vmul.f32 %v745_v35, %v741_v43  ;;  %v751_v49 = vmul.f32 %v749_v37, %v740_v42  ;;  %v832_v30 = vmul.f32 %v830_v1, %v741_v43  ;;  %v816_v35 = vrot.slane %v2063_v31, %v2111_v0  ;;  %v1722_v37 = vld [vmem:[%s2307_s3 + $0x18] ss:$0 sm:$0xff] }
 0x1e5   : > { %v755_v53 = vpop.permute.xlu0 %754  ;;  %v831_v43 = vmul.f32 %v826_v19, %v740_v42  ;;  %v853_v42 = vld [vmem:[%s2308_s4] sm:$0xf] }
 0x1e6   : > { %v753_v52 = vpop.permute.xlu1 %752  ;;  %v844_v54 = vpack.c.bf16 %v751_v49, %v734_v48  ;;  %v843_v55 = vpack.c.bf16 %v750_v47, %v733_v46  ;;  %v850_v22 = vpack.c.bf16 %v832_v30, %v822_v40  ;;  %v821_v48 = vmul.f32 %v816_v35, %v2080_v38 }
 0x1e7   : > { %v757_v61 = vsel %vm756_vm3, %v753_v52, %v755_v53  ;;  %v758_v62 = vsel %vm756_vm3, %v755_v53, %v753_v52  ;;  %v1007_v35 = vrot.slane %v933_v13, %v2099_v57  ;;  %vm1468_vm3 = vcmp.lt.s32.totalorder %v2052_v27, 16 }
 0x1e8   : > { %871 = vmatprep.subr.bf16.mxu0 %v844_v54  ;;  %v767_v9 = vmul.f32 %v762_v56, %v758_v62  ;;  %v768_v10 = vmul.f32 %v766_v58, %v757_v61  ;;  %v841_v46 = vmul.f32 %v1721_v36, %v757_v61  ;;  %v842_v47 = vmul.f32 %v1722_v37, %v758_v62 }
 0x1e9   : > { %872 = vmatpush1.bf16.msra.mxu0 %v843_v55  ;;  %v772_v3 = vpop.permute.xlu0 %771  ;;  %v849_v31 = vpack.c.bf16 %v831_v43, %v821_v48 }
 0x1ea   : > { %v770_v2 = vpop.permute.xlu1 %769  ;;  %v851_v49 = vpack.c.bf16 %v841_v46, %v841_v46  ;;  %v852_v52 = vpack.c.bf16 %v842_v47, %v842_v47  ;;  %v997_v47 = vrot.slane %v933_v13, %v2090_v50 }
 0x1eb   : > { %v774_v5 = vsel %vm773_vm4, %v770_v2, %v772_v3  ;;  %v775_v6 = vsel %vm773_vm4, %v772_v3, %v770_v2  ;;  %vm1497_vm4 = vcmp.lt.s32.totalorder %v2052_v27, 17 }
 0x1ec   : > { %v784_v11 = vmul.f32 %v779_v59, %v775_v6  ;;  %v785_v12 = vmul.f32 %v783_v60, %v774_v5  ;;  %v866_v39 = vsel %vm864_vm6, %v851_v49, 0 }
 0x1ed   : > { %v799_v15 = vpop.permute.xlu0 %798 }
 0x1ee   : > { %v797_v14 = vpop.permute.xlu1 %796  ;;  %v846_v17 = vpack.c.bf16 %v785_v12, %v768_v10  ;;  %v845_v18 = vpack.c.bf16 %v784_v11, %v767_v9  ;;  %v1051_v11 = vld [vmem:[%s2312_s8] sm:$0xff] }
 0x1ef   : > { %v801_v20 = vsel %vm800_vm5, %v797_v14, %v799_v15  ;;  %v802_v21 = vsel %vm800_vm5, %v799_v15, %v797_v14  ;;  %v932_v12 = vld [vmem:[%s2310_s6] sm:$0xff]  ;;  %v950_v14 = vrot.slane %v933_v13, %v2055_v28  ;;  %v960_v15 = vrot.slane %v933_v13, %v2058_v29 }
 0x1f0   : > { %v811_v32 = vmul.f32 %v806_v7, %v801_v20  ;;  %v812_v34 = vmul.f32 %v810_v8, %v802_v21  ;;  %873 = vmatprep.subr.bf16.mxu0 %v846_v17  ;;  %v946_v17 = vrot.slane %v932_v12, %v2055_v28  ;;  %v983_v21 = vrot.slane %v932_v12, %v2086_v45 }
 0x1f1   : > { %874 = vmatpush1.bf16.msra.mxu0 %v845_v18  ;;  %v956_v18 = vrot.slane %v932_v12, %v2058_v29  ;;  %v1003_v43 = vrot.slane %v932_v12, %v2099_v57  ;;  %vm1615_vm5 = vcmp.lt.s32.totalorder %v720_v25, 256 }
 0x1f2   : > { %v848_v23 = vpack.c.bf16 %v812_v34, %v795_v24  ;;  %v847_v41 = vpack.c.bf16 %v811_v32, %v794_v33  ;;  %v987_v24 = vrot.slane %v933_v13, %v2086_v45  ;;  %v973_v34 = vrot.slane %v932_v12, %v2083_v44 }
 0x1f3   : > { %v977_v33 = vrot.slane %v933_v13, %v2083_v44 }
 0x1f4   : > { %875 = vmatprep.subr.bf16.mxu0 %v848_v23 }
 0x1f5   : > { %876 = vmatpush1.bf16.msra.mxu0 %v847_v41 }
 0x1f6   : > { %877 = vmatprep.subr.bf16.mxu0 %v850_v22 }
 0x1f9   : > { %878 = vmatpush1.bf16.msra.mxu0 %v849_v31 }
 0x1fa   : > { %1723 = vmatprep.subr.msk.bf16.mxu0 %vm864_vm6, %v852_v52 }
 0x1fd   : > { %880 = vmatpush1.bf16.msra.mxu0 %v866_v39 }
 0x1ff   : > { %v858_v38 = vpop.permute.xlu1 %857 }
 0x200   : > { %1724 = vmatmul.mubr.msk.bf16.vlgmr.msra.gmra.mrb[0].mxu0 %vm860_vm7, %v853_v42 }
 0x201   : > { %1188 = vmatprep.mubr.bf16.mxu0 %v1866_v16 }
 0x2d3   : > { %v905_v53 = vpop.f32.mrb[0].mxu0 }
 0x2d4   : > { %v906_v54 = vadd.f32 %v905_v53, %v858_v38  ;;  %v907_v55 = vpop.f32.mrb[1].mxu0  ;;  %v1017_v53 = vrot.slane %v933_v13, %v2111_v0 }
 0x2d5   : > { %v908_v56 = vadd.f32 %v907_v55, %v858_v38  ;;  %v909_v58 = vpop.f32.mrb[2].mxu0 }
 0x2d6   : > { %v912_v59 = vmax.f32 %v906_v54, 0.0  ;;  %v910_v60 = vpop.f32.mrb[3].mxu0  ;;  %v993_v58 = vrot.slane %v932_v12, %v2090_v50 }
 0x2d7   : > { %v913_v61 = vmax.f32 %v908_v56, 0.0  ;;  %v1027_v60 = vrot.slane %v933_v13, %v2093_v51 }
 0x2d8   : > { %914 = vrot.lane.b32.xlu0 %v912_v59, %s1872_s12 }
 0x2d9   : > { %916 = vrot.lane.b32.xlu1 %v913_v61, %s1872_s12  ;;  %s1877_s12 = smov 96  }
 0x34a   : > { %v915_v62 = vpop.permute.xlu0 %914 }
 0x34b   : > { %v917_v63 = vpop.permute.xlu1 %916 }
 0x34c   : > { %v919_v1 = vsel %vm918_vm8, %v915_v62, %v917_v63  ;;  %v920_v2 = vsel %vm918_vm8, %v917_v63, %v915_v62 }
 0x34d   : > { %v921_v3 = vmax.f32 %v912_v59, %v919_v1  ;;  %v922_v4 = vmax.f32 %v913_v61, %v920_v2  ;;  %v1013_v61 = vrot.slane %v932_v12, %v2111_v0  ;;  %v1725_v2 = vld [vmem:[%s2310_s6 + $0x10] ss:$0 sm:$0xff] }
 0x34f   : > { %925 = vrot.lane.b32.xlu1 %v922_v4, %s1873_s9  ;;  %923 = vrot.lane.b32.xlu0 %v921_v3, %s1873_s9  ;;  %s1883_s9 = smov 17  }
 0x3c1   : > { %v926_v5 = vpop.permute.xlu1 %925  ;;  %v924_v6 = vpop.permute.xlu0 %923 }
 0x3c2   : > { %v928_v7 = vsel %vm927_vm9, %v924_v6, %v926_v5  ;;  %v929_v8 = vsel %vm927_vm9, %v926_v5, %v924_v6  ;;  %v1023_v5 = vrot.slane %v932_v12, %v2093_v51 }
 0x3c3   : > { %v2150_v9 = vmax.f32 %v921_v3, %v928_v7  ;;  %v2152_v10 = vmax.f32 %v922_v4, %v929_v8  ;;  %v1726_v3 = vld [vmem:[%s2310_s6 + $0x18] ss:$0 sm:$0xff] }
 0x3c5   : > { %938 = vrot.lane.b32.xlu1 %v2152_v10, %s1874_s13  ;;  %936 = vrot.lane.b32.xlu0 %v2150_v9, %s1874_s13  ;;  %v962_v37 = vmul.f32 %v960_v15, %v2150_v9  ;;  %v961_v23 = vmul.f32 %v956_v18, %v2152_v10  ;;  %v999_v59 = vmul.f32 %v997_v47, %v2152_v10 }
 0x3c6   : > { %v998_v4 = vmul.f32 %v993_v58, %v2150_v9  ;;  %v1029_v6 = vmul.f32 %v1027_v60, %v2150_v9  ;;  %v1028_v15 = vmul.f32 %v1023_v5, %v2152_v10  ;;  %v1820_v58 = vld [vmem:[%s2314_s10] sm:$0xff]  }
 0x3c7   : > { %v1522_v5 = vld [vmem:[%s2318_s14] sm:$0xff] }
 0x3c9   : > { %965 = vrot.lane.b32.xlu1 %v2152_v10, %s1875_s15  ;;  %963 = vrot.lane.b32.xlu0 %v2150_v9, %s1875_s15  ;;  %v1050_v9 = vld [vmem:[%s2311_s7] sm:$0xf] }
 0x3cd   : > { %1054 = vperm.xlu0 %1808, %v1051_v11  }
 0x437   : > { %v939_v19 = vpop.permute.xlu1 %938  ;;  %v937_v20 = vpop.permute.xlu0 %936 }
 0x438   : > { %v941_v30 = vsel %vm940_vm10, %v937_v20, %v939_v19  ;;  %v942_v32 = vsel %vm940_vm10, %v939_v19, %v937_v20 }
 0x439   : > { %v952_v36 = vmul.f32 %v950_v14, %v942_v32  ;;  %v951_v40 = vmul.f32 %v946_v17, %v941_v30  ;;  %v988_v52 = vmul.f32 %v983_v21, %v942_v32  ;;  %v989_v39 = vmul.f32 %v987_v24, %v941_v30 }
 0x43a   : > { %v1019_v63 = vmul.f32 %v1017_v53, %v942_v32  ;;  %v1018_v7 = vmul.f32 %v1013_v61, %v941_v30 }
 0x43b   : > { %v966_v41 = vpop.permute.xlu1 %965  ;;  %v964_v46 = vpop.permute.xlu0 %963  ;;  %v1041_v31 = vpack.c.bf16 %v962_v37, %v952_v36  ;;  %v1040_v49 = vpack.c.bf16 %v961_v23, %v951_v40  ;;  %v1320_v37 = vld [vmem:[%s2315_s11] sm:$0xff] }
 0x43c   : > { %v968_v22 = vsel %vm967_vm11, %v964_v46, %v966_v41  ;;  %v969_v48 = vsel %vm967_vm11, %v966_v41, %v964_v46  ;;  %v1047_v14 = vpack.c.bf16 %v1029_v6, %v1019_v63  ;;  %v1046_v17 = vpack.c.bf16 %v1028_v15, %v1018_v7  ;;  %v1209_v6 = vld [vmem:[%s2339_s1] sm:$0xff] }
 0x43d   : > { %v978_v42 = vmul.f32 %v973_v34, %v969_v48  ;;  %v979_v38 = vmul.f32 %v977_v33, %v968_v22  ;;  %v1009_v54 = vmul.f32 %v1007_v35, %v969_v48  ;;  %1066 = vmatprep.subr.bf16.mxu1 %v1041_v31  ;;  %v1008_v62 = vmul.f32 %v1003_v43, %v968_v22 }
 0x43e   : > { %1067 = vmatpush1.bf16.msra.mxu1 %v1040_v49  ;;  %v1038_v11 = vmul.f32 %v1725_v2, %v969_v48  ;;  %v1039_v13 = vmul.f32 %v1726_v3, %v968_v22 }
 0x43f   : > { %v1043_v55 = vpack.c.bf16 %v989_v39, %v979_v38  ;;  %v1042_v56 = vpack.c.bf16 %v988_v52, %v978_v42  ;;  %v1045_v1 = vpack.c.bf16 %v1009_v54, %v999_v59  ;;  %v1044_v8 = vpack.c.bf16 %v1008_v62, %v998_v4  ;;  %v1821_v59 = vld [vmem:[%s2314_s10 + $0x8] sm:$0xff]  }
 0x440   : > { %v1049_v18 = vpack.c.bf16 %v1039_v13, %v1039_v13  ;;  %v1048_v19 = vpack.c.bf16 %v1038_v11, %v1038_v11  ;;  %v1243_v11 = vrot.slane %v1209_v6, %v2058_v29  ;;  %v1247_v13 = vrot.slane %v1209_v6, %v2099_v57 }
 0x441   : > { %1068 = vmatprep.subr.bf16.mxu1 %v1043_v55 }
 0x442   : > { %1069 = vmatpush1.bf16.msra.mxu1 %v1042_v56  ;;  %v1061_v12 = vsel %vm864_vm6, %v1048_v19, 0  ;;  %v1276_v19 = vrot.slane %v1209_v6, %v2111_v0 }
 0x443   : > { %1070 = vmatprep.subr.bf16.mxu1 %v1045_v1 }
 0x446   : > { %1071 = vmatpush1.bf16.msra.mxu1 %v1044_v8  ;;  %v1214_v8 = vrot.slane %v1209_v6, %v2055_v28 }
 0x447   : > { %1072 = vmatprep.subr.bf16.mxu1 %v1047_v14  ;;  %v1218_v14 = vrot.slane %v1209_v6, %v2090_v50 }
 0x44a   : > { %1073 = vmatpush1.bf16.msra.mxu1 %v1046_v17 }
 0x44b   : > { %1727 = vmatprep.subr.msk.bf16.mxu1 %vm864_vm6, %v1049_v18  ;;  %v1272_v18 = vrot.slane %v1209_v6, %v2083_v44 }
 0x44c   : > { %v1055_v20 = vpop.permute.xlu0 %1054 }
 0x44e   : > { %1075 = vmatpush1.bf16.msra.mxu1 %v1061_v12  ;;  %v1224_v12 = vrot.slane %v1214_v8, %v2055_v28 }
 0x451   : > { %1728 = vmatmul.mubr.msk.bf16.vlgmr.msra.gmra.mrb[0].mxu1 %vm860_vm7, %v1050_v9  ;;  %v1253_v9 = vrot.slane %v1243_v11, %v2058_v29 }
 0x452   : > { %1390 = vmatprep.mubr.bf16.mxu1 %v1866_v16 }
 0x524   : > { %v1100_v10 = vpop.f32.mrb[0].mxu1 }
 0x525   : > { %v1101_v21 = vadd.f32 %v1100_v10, %v1055_v20  ;;  %v1102_v24 = vpop.f32.mrb[1].mxu1 }
 0x526   : > { %v1103_v30 = vadd.f32 %v1102_v24, %v1055_v20  ;;  %v1104_v32 = vpop.f32.mrb[2].mxu1  ;;  %v1257_v20 = vrot.slane %v1247_v13, %v2058_v29  ;;  %v1301_v24 = vrot.slane %v1209_v6, %v2086_v45 }
 0x527   : > { %v1107_v34 = vmax.f32 %v1101_v21, 0.0  ;;  %v1105_v33 = vpop.f32.mrb[3].mxu1  ;;  %v1228_v32 = vrot.slane %v1218_v14, %v2055_v28 }
 0x528   : > { %v1108_v35 = vmax.f32 %v1103_v30, 0.0  ;;  %v1305_v30 = vrot.slane %v1209_v6, %v2093_v51  ;;  %v1286_v33 = vrot.slane %v1276_v19, %v2083_v44  ;;  %v1823_v6 = vld [vmem:[%s2340_s22 + $0x8] sm:$0xff]   ;;  %v1411_v19 = vld [vmem:[%s2341_s26] sm:$0xff] }
 0x52a   : > { %v1810_v36 = vpack.i.bf16 %v1108_v35, %v1107_v34 }
 0x52c   : > { %1811 = vrot.lane.b32.xlu1 %v1810_v36, %s1876_s23 }
 0x530   : > { %1323 = vperm.xlu1 %1809, %v1320_v37  }
 0x59e   : > { %v1812_v40 = vpop.permute.xlu1 %1811 }
 0x59f   : > { %v1814_v23 = vunpack.i.h.bf16 %v1812_v40  ;;  %v1813_v41 = vunpack.i.l.bf16 %v1812_v40 }
 0x5a1   : > { %v1114_v43 = vsel %vm1113_vm12, %v1813_v41, %v1814_v23  ;;  %v1115_v46 = vsel %vm1113_vm12, %v1814_v23, %v1813_v41 }
 0x5a2   : > { %v1116_v47 = vmax.f32 %v1107_v34, %v1114_v43  ;;  %v1117_v22 = vmax.f32 %v1108_v35, %v1115_v46  ;;  %v1282_v34 = vrot.slane %v1272_v18, %v2083_v44  ;;  %v1311_v43 = vrot.slane %v1301_v24, %v2086_v45  ;;  %v1535_v18 = vld [vmem:[#allocation3] sm:$0x1] }
 0x5a3   : > { %v1315_v46 = vrot.slane %v1305_v30, %v2086_v45 }
 0x5a4   : > { %v1815_v48 = vpack.i.bf16 %v1117_v22, %v1116_v47 }
 0x5a6   : > { %1816 = vrot.lane.b32.xlu0 %v1815_v48, %s1877_s12  ;;  %s1882_s12 = smov 16  }
 0x5af   : > { %v1324_v7 = vpop.permute.xlu1 %1323 }
 0x618   : > { %v1817_v31 = vpop.permute.xlu0 %1816 }
 0x619   : > { %v1819_v49 = vunpack.i.h.bf16 %v1817_v31  ;;  %v1818_v52 = vunpack.i.l.bf16 %v1817_v31 }
 0x61b   : > { %v1123_v39 = vsel %vm1122_vm13, %v1818_v52, %v1819_v49  ;;  %v1124_v42 = vsel %vm1122_vm13, %v1819_v49, %v1818_v52 }
 0x61c   : > { %v1126_v38 = vmax.f32 %v1117_v22, %v1124_v42  ;;  %v1125_v53 = vmax.f32 %v1116_v47, %v1123_v39 }
 0x61e   : > { %v1132_v54 = vpack.c.bf16 %v1126_v38, %v1126_v38  ;;  %v1131_v55 = vpack.c.bf16 %v1125_v53, %v1125_v53 }
 0x620   : > { %1731 = vmatprep.subr.msk.bf16.mxu0 %vm864_vm6, %v1132_v54  ;;  %v1151_v56 = vsel %vm864_vm6, %v1131_v55, 0 }
 0x621   : > { %1157 = vmatpush1.bf16.msra.mxu0 %v1151_v56 }
 0x624   : > { %1732 = vmatmul.mubr.msk.bf16.vlgmr.msra.gmra.mrb[4].mxu0 %vm1143_vm14, %v1820_v58 }
 0x625   : > { %1198 = vmatprep.mubr.bf16.mxu0 %v1866_v16 }
 0x62c   : > { %1733 = vmatmul.mubr.msk.bf16.gmra.mrb[8].mxu0 %vm1143_vm14, %v1821_v59 }
 0x62d   : > { %1586 = vmatprep.mubr.bf16.mxu0 %v1866_v16 }
 0x6f7   : > { %v1190_v60 = vpop.f32.mrb[4].mxu0 }
 0x6f8   : > { %v1192_v61 = vpop.f32.mrb[5].mxu0  ;;  %v1229_v47 = vmul.f32 %v1224_v12, %v1190_v60 }
 0x6f9   : > { %v1194_v62 = vpop.f32.mrb[6].mxu0  ;;  %v1230_v22 = vmul.f32 %v1228_v32, %v1192_v61  ;;  %v1474_v32 = vrot.slane %v1411_v19, %v2083_v44 }
 0x6fa   : > { %1233 = vrot.lane.b32.xlu1 %v1194_v62, %s1878_s27  ;;  %v1196_v63 = vpop.f32.mrb[7].mxu0 }
 0x6fb   : > { %1235 = vrot.lane.b32.xlu0 %v1196_v63, %s1878_s27 }
 0x6ff   : > { %v1200_v1 = vpop.f32.mrb[8].mxu0 }
 0x700   : > { %1262 = vrot.lane.b32.xlu1 %v1200_v1, %s1879_s28  ;;  %v1202_v2 = vpop.f32.mrb[9].mxu0 }
 0x701   : > { %1264 = vrot.lane.b32.xlu0 %v1202_v2, %s1879_s28  ;;  %v1204_v3 = vpop.f32.mrb[10].mxu0 }
 0x702   : > { %v1206_v4 = vpop.f32.mrb[11].mxu0 }
 0x704   : > { %1293 = vrot.lane.b32.xlu1 %v1206_v4, %s1880_s29 }
 0x705   : > { %1291 = vrot.lane.b32.xlu0 %v1204_v3, %s1880_s29  ;;  %s2342_s29 = sld [smem:[#allocation14_spill]] }
 0x709   : > { %1525 = vperm.xlu0 %1808, %v1522_v5   ;;  %v1822_v5 = vld [vmem:[%s2340_s22] sm:$0xff]  }
 0x76c   : > { %v1234_v15 = vpop.permute.xlu1 %1233 }
 0x76d   : > { %v1236_v17 = vpop.permute.xlu0 %1235 }
 0x76e   : > { %v1238_v10 = vsel %vm1237_vm15, %v1234_v15, %v1236_v17  ;;  %v1239_v21 = vsel %vm1237_vm15, %v1236_v17, %v1234_v15 }
 0x76f   : > { %v1258_v36 = vmul.f32 %v1253_v9, %v1239_v21  ;;  %v1259_v37 = vmul.f32 %v1257_v20, %v1238_v10  ;;  %v1416_v9 = vrot.slane %v1411_v19, %v2055_v28  ;;  %v1445_v20 = vrot.slane %v1411_v19, %v2058_v29 }
 0x770   : > { %v1449_v10 = vrot.slane %v1411_v19, %v2099_v57  ;;  %v1420_v21 = vrot.slane %v1411_v19, %v2090_v50  ;;  %v1503_v57 = vrot.slane %v1411_v19, %v2086_v45  ;;  %v1507_v50 = vrot.slane %v1411_v19, %v2093_v51 }
 0x771   : > { %v1260_v52 = vadd.f32 %v1258_v36, %v1229_v47  ;;  %v1261_v39 = vadd.f32 %v1259_v37, %v1230_v22 }
 0x772   : > { %v1263_v35 = vpop.permute.xlu1 %1262  ;;  %v1459_v36 = vrot.slane %v1449_v10, %v2058_v29  ;;  %v1517_v51 = vrot.slane %v1507_v50, %v2086_v45 }
 0x773   : > { %v1265_v40 = vpop.permute.xlu0 %1264 }
 0x774   : > { %v1267_v23 = vsel %vm1266_vm0, %v1263_v35, %v1265_v40  ;;  %v1268_v41 = vsel %vm1266_vm0, %v1265_v40, %v1263_v35  ;;  %v1455_v35 = vrot.slane %v1445_v20, %v2058_v29 }
 0x775   : > { %v1287_v48 = vmul.f32 %v1282_v34, %v1268_v41  ;;  %v1288_v31 = vmul.f32 %v1286_v33, %v1267_v23  ;;  %v1478_v34 = vrot.slane %v1411_v19, %v2111_v0  ;;  %v1426_v33 = vrot.slane %v1416_v9, %v2055_v28 }
 0x776   : > { %v1294_v49 = vpop.permute.xlu1 %1293  ;;  %v1430_v23 = vrot.slane %v1420_v21, %v2055_v28  ;;  %v1484_v41 = vrot.slane %v1474_v32, %v2083_v44 }
 0x777   : > { %v1292_v42 = vpop.permute.xlu0 %1291  ;;  %v1289_v54 = vadd.f32 %v1287_v48, %v1260_v52  ;;  %v1290_v55 = vadd.f32 %v1288_v31, %v1261_v39  ;;  %v1488_v0 = vrot.slane %v1478_v34, %v2083_v44  ;;  %v1513_v31 = vrot.slane %v1503_v57, %v2086_v45 }
 0x778   : > { %v1296_v38 = vsel %vm1295_vm1, %v1292_v42, %v1294_v49  ;;  %v1297_v53 = vsel %vm1295_vm1, %v1294_v49, %v1292_v42 }
 0x779   : > { %v1316_v56 = vmul.f32 %v1311_v43, %v1297_v53  ;;  %v1317_v58 = vmul.f32 %v1315_v46, %v1296_v38 }
 0x77b   : > { %v1318_v59 = vadd.f32 %v1316_v56, %v1289_v54  ;;  %v1319_v62 = vadd.f32 %v1317_v58, %v1290_v55 }
 0x77d   : > { %v1327_v63 = vadd.f32 %v1324_v7, %v1319_v62  ;;  %v1326_v1 = vadd.f32 %v1324_v7, %v1318_v59 }
 0x77f   : > { %v1329_v2 = vmax.f32 %v1327_v63, 0.0  ;;  %v1328_v3 = vmax.f32 %v1326_v1, 0.0 }
 0x781   : > { %v1335_v60 = vpack.c.bf16 %v1329_v2, %v1329_v2  ;;  %v1334_v61 = vpack.c.bf16 %v1328_v3, %v1328_v3 }
 0x783   : > { %1736 = vmatprep.subr.msk.bf16.mxu1 %vm864_vm6, %v1335_v60  ;;  %v1353_v4 = vsel %vm864_vm6, %v1334_v61, 0 }
 0x784   : > { %1359 = vmatpush1.bf16.msra.mxu1 %v1353_v4 }
 0x787   : > { %1737 = vmatmul.mubr.msk.bf16.vlgmr.msra.gmra.mrb[4].mxu1 %vm1143_vm14, %v1822_v5 }
 0x788   : > { %1400 = vmatprep.mubr.bf16.mxu1 %v1866_v16  ;;  %v1526_v12 = vpop.permute.xlu0 %1525 }
 0x78f   : > { %1738 = vmatmul.mubr.msk.bf16.gmra.mrb[8].mxu1 %vm1143_vm14, %v1823_v6  ;;  %v1532_v6 = vld [vmem:[%s2342_s29] sm:$0x1] }
 0x85a   : > { %v1392_v7 = vpop.f32.mrb[4].mxu1 }
 0x85b   : > { %v1394_v8 = vpop.f32.mrb[5].mxu1  ;;  %v1431_v49 = vmul.f32 %v1426_v33, %v1392_v7  ;;  %v1884_v7 = vmov 1966171168  }
 0x85c   : > { %v1396_v11 = vpop.f32.mrb[6].mxu1  ;;  %v1432_v52 = vmul.f32 %v1430_v23, %v1394_v8  ;;  %v1599_v8 = vunpack.c.l.s4 %v1884_v7 }
 0x85d   : > { %1435 = vrot.lane.b32.xlu0 %v1396_v11, %s1881_s25  ;;  %v1398_v13 = vpop.f32.mrb[7].mxu1 }
 0x85e   : > { %1437 = vrot.lane.b32.xlu1 %v1398_v13, %s1881_s25  ;;  %v1600_v13 = vunpack.c.0.s8 %v1599_v8 }
 0x860   : > { %v1603_v19 = vsub.s32 %v1600_v13, %v2049_v26 }
 0x862   : > { %v1402_v14 = vpop.f32.mrb[8].mxu1 }
 0x863   : > { %1464 = vrot.lane.b32.xlu0 %v1402_v14, %s1882_s12  ;;  %v1404_v15 = vpop.f32.mrb[9].mxu1 }
 0x864   : > { %1466 = vrot.lane.b32.xlu1 %v1404_v15, %s1882_s12  ;;  %v1406_v17 = vpop.f32.mrb[10].mxu1 }
 0x865   : > { %v1408_v16 = vpop.f32.mrb[11].mxu1 }
 0x867   : > { %1495 = vrot.lane.b32.xlu0 %v1408_v16, %s1883_s9 }
 0x868   : > { %1493 = vrot.lane.b32.xlu1 %v1406_v17, %s1883_s9 }
 0x86c   : > { %1538 = vperm.xlu1 %1809, %v1535_v18  }
 0x8cf   : > { %v1436_v24 = vpop.permute.xlu0 %1435 }
 0x8d0   : > { %v1438_v30 = vpop.permute.xlu1 %1437 }
 0x8d1   : > { %v1440_v37 = vsel %vm1439_vm2, %v1436_v24, %v1438_v30  ;;  %v1441_v40 = vsel %vm1439_vm2, %v1438_v30, %v1436_v24 }
 0x8d2   : > { %v1460_v46 = vmul.f32 %v1455_v35, %v1441_v40  ;;  %v1461_v47 = vmul.f32 %v1459_v36, %v1440_v37 }
 0x8d4   : > { %v1462_v53 = vadd.f32 %v1460_v46, %v1431_v49  ;;  %v1463_v54 = vadd.f32 %v1461_v47, %v1432_v52 }
 0x8d5   : > { %v1465_v43 = vpop.permute.xlu0 %1464 }
 0x8d6   : > { %v1467_v22 = vpop.permute.xlu1 %1466 }
 0x8d7   : > { %v1469_v29 = vsel %vm1468_vm3, %v1465_v43, %v1467_v22  ;;  %v1470_v48 = vsel %vm1468_vm3, %v1467_v22, %v1465_v43 }
 0x8d8   : > { %v1489_v39 = vmul.f32 %v1484_v41, %v1470_v48  ;;  %v1490_v42 = vmul.f32 %v1488_v0, %v1469_v29 }
 0x8d9   : > { %v1496_v38 = vpop.permute.xlu0 %1495 }
 0x8da   : > { %v1494_v44 = vpop.permute.xlu1 %1493  ;;  %v1491_v58 = vadd.f32 %v1489_v39, %v1462_v53  ;;  %v1492_v59 = vadd.f32 %v1490_v42, %v1463_v54 }
 0x8db   : > { %v1498_v55 = vsel %vm1497_vm4, %v1494_v44, %v1496_v38  ;;  %v1499_v56 = vsel %vm1497_vm4, %v1496_v38, %v1494_v44 }
 0x8dc   : > { %v1518_v62 = vmul.f32 %v1513_v31, %v1499_v56  ;;  %v1519_v27 = vmul.f32 %v1517_v51, %v1498_v55 }
 0x8de   : > { %v1520_v63 = vadd.f32 %v1518_v62, %v1491_v58  ;;  %v1521_v1 = vadd.f32 %v1519_v27, %v1492_v59 }
 0x8e0   : > { %v1529_v2 = vadd.f32 %v1526_v12, %v1521_v1  ;;  %v1528_v3 = vadd.f32 %v1526_v12, %v1520_v63 }
 0x8e2   : > { %v1531_v60 = vmax.f32 %v1529_v2, 0.0  ;;  %v1530_v45 = vmax.f32 %v1528_v3, 0.0 }
 0x8e4   : > { %v1534_v61 = vpack.c.bf16 %v1531_v60, %v1531_v60  ;;  %v1533_v4 = vpack.c.bf16 %v1530_v45, %v1530_v45 }
 0x8e6   : > { %1739 = vmatprep.subr.msk.bf16.mxu0 %vm864_vm6, %v1534_v61  ;;  %v1549_v5 = vsel %vm864_vm6, %v1533_v4, 0 }
 0x8e7   : > { %1555 = vmatpush1.bf16.msra.mxu0 %v1549_v5 }
 0x8ea   : > { %1740 = vmatmul.mubr.msk.bf16.vlgmr.msra.gmra.mrb[12].mxu0 %vm1143_vm14, %v1532_v6 }
 0x8eb   : > { %v1539_v11 = vpop.permute.xlu1 %1538 }
 0x8ec   : > { %v1544_v14 = vrot.slane %v1539_v11, %v2055_v28 }
 0x9bd   : > { %v1588_v15 = vpop.f32.mrb[12].mxu0 }
 0x9be   : > { %v1589_v17 = vadd.f32 %v1588_v15, %v1544_v14  ;;  %v1590_v16 = vpop.f32.mrb[13].mxu0 }
 0x9bf   : > { %v1591_v18 = vadd.f32 %v1590_v16, %v1544_v14  ;;  %v1592_v12 = vpop.f32.mrb[14].mxu0 }
 0x9c0   : > { %v1593_v9 = vpop.f32.mrb[15].mxu0 }
 0x9c1   : > { %v1597_v20 = vcombine.low %v1589_v17, %v1591_v18 }
 0x9c3   : > { %v1604_v10 = vrot.slane %v1597_v20, %v1603_v19 }
 0x9c5   : > { %v1611_v21 = vrot.slane %v1604_v10, %v1603_v19 }
 0x9c7   : > { %1617 = vst.msk [vmem:[%s2017_s30] sm:$0x3] %vm1615_vm5, %v1611_v21 }
 0x9c8 PF: > { %s2343_s0 = sld [smem:[#allocation6_spill]]  ;;  %s2344_s26 = sld [smem:[#allocation4_spill]] }
 0x9c9   : > { %s2345_s27 = sld [smem:[#allocation5_spill]]  ;;  %s2346_s28 = sld [smem:[#allocation7_spill]] }
 0x9ca   : > { %s2347_s29 = sld [smem:[#allocation8_spill]] }
 0x9ce   : > { %s29_s0 = sadd.s32 1, %s2343_s0  }
 0x9cf   : > { %p26_p9 = scmp.ge.s32.totalorder %s29_s0, 6  }
 0x9d1   :  { %28 = sbr.rel (!%p26_p9) target bundleno = 7 (0x7), region = 129 }

</bundles_post_ra>
